<compile_context>
chip_gen: v7x
topology: tpu7x:2x2x1
jax: 0.10.0
libtpu: 0.0.40
codegen_flags: <defaults>
</compile_context>

<pallas_src>
import functools
from typing import NamedTuple

import jax
import jax.numpy as jnp
from jax.experimental import pallas as pl
from jax.experimental.pallas import tpu as pltpu

_LANE = 128      # vreg lane width (last dim)
_SUBLANE = 8     # vreg sublane width for 32-bit types (second-to-last dim)


def _round_up(n, m):
    return ((n + m - 1) // m) * m


def _sublane_for(dtype):
    """Sublane granularity: 8 rows for f32, 16 for bf16, 32 for 8-bit types."""
    itemsize = jnp.dtype(dtype).itemsize
    return max(_SUBLANE, (4 // itemsize) * _SUBLANE)


def _vmem_ceiling_bytes():
    """Generation-aware VMEM ceiling with headroom for Mosaic scratch/semaphores."""
    try:
        info = pltpu.get_tpu_info()
        capacity = int(getattr(info, "vmem_capacity_bytes", 64 << 20))
    except Exception:
        capacity = 64 << 20      # conservative (v7x-sized) fallback
    return max(capacity - (8 << 20), 16 << 20)


# --------------------------------------------------------------------------- kernel
def mlp_kernel(x_ref,
               w1_ref, b1_ref,
               w2_ref, b2_ref,
               w3_ref, b3_ref,
               w4_ref, b4_ref,
               w5_ref, b5_ref,
               wo_ref, bo_ref,
               o_ref, *, act_dtype):
    """Whole forward pass for one batch tile, fused in VMEM."""

    def layer(h, w_ref, b_ref, activate):
        acc = jnp.dot(h, w_ref[...],
                      preferred_element_type=jnp.float32)   # MXU, f32 accumulation
        acc = acc + b_ref[0]                                 # single row-broadcast bias
        if activate:
            acc = jnp.tanh(acc.astype(act_dtype))            # EUP (bf16 on v6e/v7x path)
        return acc

    h = x_ref[...]
    h = layer(h, w1_ref, b1_ref, True)
    h = layer(h, w2_ref, b2_ref, True)
    h = layer(h, w3_ref, b3_ref, True)
    h = layer(h, w4_ref, b4_ref, True)
    h = layer(h, w5_ref, b5_ref, True)
    h = layer(h, wo_ref, bo_ref, False)

    o_ref[...] = h.astype(o_ref.dtype)


# ------------------------------------------------------------------ padded params
class PreparedMLPParams(NamedTuple):
    flat: tuple          # (w1, b1, ..., wo, bo) lane-padded arrays
    d_in: int
    d_in_p: int
    out_dim: int
    out_p: int
    max_width_p: int     # widest padded feature dim (for VMEM budgeting)
    compute_dtype: object


def prepare_mlp_params(params, compute_dtype=jnp.bfloat16):
    """Pad all six (W, b) pairs to 128-lane widths ONCE.  Cache the result and pass
    it to mlp_forward on the hot path to avoid per-call weight-sized HBM writes."""
    d_in = params[0][0].shape[0]
    out_dim = params[-1][0].shape[1]
    d_in_p = _round_up(d_in, _LANE)

    flat = []
    prev_p = d_in_p
    max_width_p = d_in_p
    for (w, b) in params:
        din, dout = w.shape
        dout_p = _round_up(dout, _LANE)
        w_p = jnp.zeros((prev_p, dout_p), compute_dtype).at[:din, :dout].set(
            w.astype(compute_dtype))
        b_p = jnp.zeros((1, dout_p), jnp.float32).at[:, :dout].set(
            b.reshape(1, -1).astype(jnp.float32))     # bias / epilogue stay f32
        flat += [w_p, b_p]
        prev_p = dout_p
        max_width_p = max(max_width_p, dout_p)

    return PreparedMLPParams(tuple(flat), d_in, d_in_p, out_dim, prev_p,
                             max_width_p, compute_dtype)


# ------------------------------------------------------------------------ wrapper
def mlp_forward(x, params, *, batch_tile=None, compute_dtype=jnp.bfloat16):
    """x: [B, input_dim] float32.
    params: list of (W[in,out], b[1,out]) pairs, OR a PreparedMLPParams.
    Returns [B, output_dim] float32."""
    prepared = (params if isinstance(params, PreparedMLPParams)
                else prepare_mlp_params(params, compute_dtype=compute_dtype))
    compute_dtype = prepared.compute_dtype
    itemsize = jnp.dtype(compute_dtype).itemsize
    act_dtype = (jnp.float32
                 if jnp.dtype(compute_dtype) == jnp.dtype(jnp.float32)
                 else compute_dtype)
    # TODO(synk): on v5e (no bf16 EUP) force act_dtype=f32 explicitly via a chip check.

    B, d_in = x.shape
    assert d_in == prepared.d_in, "input feature dim does not match params"
    d_in_p, out_p, out_dim = prepared.d_in_p, prepared.out_p, prepared.out_dim

    # ---- batch tiling: dtype-aware sublane rounding, >=2 steps for megacore --------
    sub = _sublane_for(compute_dtype)
    if batch_tile is None:
        B_r = _round_up(B, sub)
        if B_r <= 128:
            batch_tile = B_r               # whole (small) batch in a single grid step
        else:
            # >=2 grid steps so both v7x TensorCores get work; 512-row cap amortizes
            # the ~0.35us per-step overhead while keeping x/out tiles small in VMEM.
            batch_tile = min(_round_up(pl.cdiv(B_r, 2), sub), 512)
    batch_tile = _round_up(batch_tile, sub)
    B_p = _round_up(B, batch_tile)
    grid = (B_p // batch_tile,)

    if B_p == B and d_in_p == d_in and x.dtype == jnp.dtype(compute_dtype):
        x_p = x                                            # already aligned: no pad copy
    else:
        x_p = jnp.zeros((B_p, d_in_p), compute_dtype).at[:B, :d_in].set(
            x.astype(compute_dtype))

    # ---- VMEM budget: real footprint, generation-aware ceiling ---------------------
    weight_bytes = sum(int(a.size) * a.dtype.itemsize for a in prepared.flat)
    io_bytes = 2 * batch_tile * (d_in_p * itemsize + out_p * 4)   # double-buffered x/out
    interm_bytes = 2 * batch_tile * prepared.max_width_p * 4      # live f32 intermediates
    ceiling = _vmem_ceiling_bytes()

    def budget_for(n_weight_buffers):
        b = n_weight_buffers * weight_bytes + io_bytes + interm_bytes + (4 << 20)
        return int(min(max(b, 24 << 20), ceiling))

    kernel_fn = functools.partial(mlp_kernel, act_dtype=act_dtype)
    out_shape = jax.ShapeDtypeStruct((B_p, out_p), jnp.float32)
    out_spec = pl.BlockSpec((batch_tile, out_p), lambda i: (i, 0))

    def run(single_buffer_weights):
        # Weight/bias index_maps are constant -> Pallas only DMAs them once;
        # single-buffering frees weight_bytes of VMEM at zero DMA cost.
        w_kwargs = (dict(pipeline_mode=pl.Buffered(1))
                    if single_buffer_weights else {})
        in_specs = [pl.BlockSpec((batch_tile, d_in_p), lambda i: (i, 0))]
        for arr in prepared.flat:
            in_specs.append(pl.BlockSpec(arr.shape, lambda i: (0, 0), **w_kwargs))
        return pl.pallas_call(
            kernel_fn,
            out_shape=out_shape,
            grid_spec=pltpu.PrefetchScalarGridSpec(
                num_scalar_prefetch=0,
                grid=grid,
                in_specs=in_specs,
                out_specs=out_spec),
            compiler_params=pltpu.CompilerParams(
                dimension_semantics=("parallel",),        # megacore-shard batch tiles
                vmem_limit_bytes=budget_for(1 if single_buffer_weights else 2)),
        )(x_p, *prepared.flat)

    try:
        out_padded = run(True)
    except Exception:
        # pl.Buffered(1) not supported on this jax version -> default double-buffering.
        out_padded = run(False)

    # TODO(synk): stream weights layer-by-layer (pltpu.emit_pipeline over the output-N
    # dim) once resident weights exceed ~0.75x the VMEM ceiling (reached at half the
    # hidden_dim on v7x's 64 MiB vs v5e/v6e's 128 MiB).
    return out_padded[:B, :out_dim]


# ------------------------------------------------------------------------- helpers
def init_mlp_params(key, input_dim, hidden_dim, output_dim):
    """PyTorch nn.Linear default init (U[-1/sqrt(fan_in), 1/sqrt(fan_in)]).
    Weights stored as [in_dim, out_dim]."""
    dims = [(input_dim, hidden_dim),
            (hidden_dim, hidden_dim),
            (hidden_dim, hidden_dim),
            (hidden_dim, hidden_dim),
            (hidden_dim, hidden_dim),
            (hidden_dim, output_dim)]
    params = []
    for (din, dout) in dims:
        key, kw, kb = jax.random.split(key, 3)
        bound = 1.0 / jnp.sqrt(din)
        w = jax.random.uniform(kw, (din, dout), jnp.float32, -bound, bound)
        b = jax.random.uniform(kb, (1, dout), jnp.float32, -bound, bound)
        params.append((w, b))
    return params


def mlp_reference(x, params):
    h = x
    for i, (w, b) in enumerate(params):
        h = h @ w + b
        if i < len(params) - 1:
            h = jnp.tanh(h)
    return h


if __name__ == "__main__":
    key = jax.random.PRNGKey(0)
    k_x, k_p = jax.random.split(key)

    input_dim, hidden_dim, output_dim = 16, 32, 8
    batch = 16

    x = jax.random.normal(k_x, (batch, input_dim), jnp.float32)
    params = init_mlp_params(k_p, input_dim, hidden_dim, output_dim)
    ref = mlp_reference(x, params)

    # f32 operand path: exact parity with the pure-JAX reference.
    out_f32 = jax.block_until_ready(mlp_forward(x, params, compute_dtype=jnp.float32))
    assert out_f32.shape == (batch, output_dim)
    assert jnp.allclose(out_f32, ref, atol=1e-5, rtol=1e-5), "f32 path mismatch"

    # bf16 operand path (default): MXU-native operands, f32 accumulation.
    prepared_bf16 = prepare_mlp_params(params, compute_dtype=jnp.bfloat16)
    out_bf16 = jax.block_until_ready(mlp_forward(x, prepared_bf16))
    assert out_bf16.shape == (batch, output_dim)
    assert jnp.allclose(out_bf16, ref, atol=5e-2, rtol=5e-2), "bf16 path mismatch"

    print("KERNEL_OK")
</pallas_src>

<mosaic_0001>
module attributes {stable_mosaic.version = 11 : i64} {
  func.func @mlp_kernel(%arg0: i32, %arg1: memref<16x128xf32, #tpu.memory_space<vmem>>, %arg2: memref<128x128xf32, #tpu.memory_space<vmem>>, %arg3: memref<1x128xf32, #tpu.memory_space<vmem>>, %arg4: memref<128x128xf32, #tpu.memory_space<vmem>>, %arg5: memref<1x128xf32, #tpu.memory_space<vmem>>, %arg6: memref<128x128xf32, #tpu.memory_space<vmem>>, %arg7: memref<1x128xf32, #tpu.memory_space<vmem>>, %arg8: memref<128x128xf32, #tpu.memory_space<vmem>>, %arg9: memref<1x128xf32, #tpu.memory_space<vmem>>, %arg10: memref<128x128xf32, #tpu.memory_space<vmem>>, %arg11: memref<1x128xf32, #tpu.memory_space<vmem>>, %arg12: memref<128x128xf32, #tpu.memory_space<vmem>>, %arg13: memref<1x128xf32, #tpu.memory_space<vmem>>, %arg14: memref<16x128xf32, #tpu.memory_space<vmem>>) attributes {dimension_semantics = [#tpu.dimension_semantics<parallel>], iteration_bounds = array<i64: 1>, scalar_prefetch = 0 : i64, scratch_operands = 0 : i64, tpu.core_type = #tpu.core_type<tc>, window_params = [{transform_indices = @transform_0, window_bounds = array<i64: 16, 128>}, {pipeline_mode = #tpu.pipeline_mode<synchronous>, transform_indices = @transform_1, window_bounds = array<i64: 128, 128>}, {pipeline_mode = #tpu.pipeline_mode<synchronous>, transform_indices = @transform_2, window_bounds = array<i64: 1, 128>}, {pipeline_mode = #tpu.pipeline_mode<synchronous>, transform_indices = @transform_3, window_bounds = array<i64: 128, 128>}, {pipeline_mode = #tpu.pipeline_mode<synchronous>, transform_indices = @transform_4, window_bounds = array<i64: 1, 128>}, {pipeline_mode = #tpu.pipeline_mode<synchronous>, transform_indices = @transform_5, window_bounds = array<i64: 128, 128>}, {pipeline_mode = #tpu.pipeline_mode<synchronous>, transform_indices = @transform_6, window_bounds = array<i64: 1, 128>}, {pipeline_mode = #tpu.pipeline_mode<synchronous>, transform_indices = @transform_7, window_bounds = array<i64: 128, 128>}, {pipeline_mode = #tpu.pipeline_mode<synchronous>, transform_indices = @transform_8, window_bounds = array<i64: 1, 128>}, {pipeline_mode = #tpu.pipeline_mode<synchronous>, transform_indices = @transform_9, window_bounds = array<i64: 128, 128>}, {pipeline_mode = #tpu.pipeline_mode<synchronous>, transform_indices = @transform_10, window_bounds = array<i64: 1, 128>}, {pipeline_mode = #tpu.pipeline_mode<synchronous>, transform_indices = @transform_11, window_bounds = array<i64: 128, 128>}, {pipeline_mode = #tpu.pipeline_mode<synchronous>, transform_indices = @transform_12, window_bounds = array<i64: 1, 128>}, {transform_indices = @transform_13, window_bounds = array<i64: 16, 128>}]} {
    %c0 = arith.constant 0 : index
    %c0_0 = arith.constant 0 : index
    %0 = vector.load %arg1[%c0, %c0_0] : memref<16x128xf32, #tpu.memory_space<vmem>>, vector<16x128xf32>
    %c0_1 = arith.constant 0 : index
    %c0_2 = arith.constant 0 : index
    %1 = vector.load %arg2[%c0_1, %c0_2] : memref<128x128xf32, #tpu.memory_space<vmem>>, vector<128x128xf32>
    %cst = arith.constant dense<0.000000e+00> : vector<16x128xf32>
    %2 = tpu.matmul %0, %1, %cst {dimension_numbers = #tpu.dot_dimension_numbers<[1], [0], [0], [1], [0, 0, 1, 1], [], []>} : vector<16x128xf32>, vector<128x128xf32>, vector<16x128xf32> -> vector<16x128xf32>
    %c0_3 = arith.constant 0 : index
    %c0_4 = arith.constant 0 : index
    %3 = vector.load %arg3[%c0_3, %c0_4] : memref<1x128xf32, #tpu.memory_space<vmem>>, vector<1x128xf32>
    %4 = vector.shape_cast %3 : vector<1x128xf32> to vector<128xf32>
    %5 = vector.shape_cast %4 : vector<128xf32> to vector<1x128xf32>
    %6 = vector.broadcast %5 : vector<1x128xf32> to vector<16x128xf32>
    %7 = arith.addf %2, %6 : vector<16x128xf32>
    %8 = math.tanh %7 : vector<16x128xf32>
    %c0_5 = arith.constant 0 : index
    %c0_6 = arith.constant 0 : index
    %9 = vector.load %arg4[%c0_5, %c0_6] : memref<128x128xf32, #tpu.memory_space<vmem>>, vector<128x128xf32>
    %cst_7 = arith.constant dense<0.000000e+00> : vector<16x128xf32>
    %10 = tpu.matmul %8, %9, %cst_7 {dimension_numbers = #tpu.dot_dimension_numbers<[1], [0], [0], [1], [0, 0, 1, 1], [], []>} : vector<16x128xf32>, vector<128x128xf32>, vector<16x128xf32> -> vector<16x128xf32>
    %c0_8 = arith.constant 0 : index
    %c0_9 = arith.constant 0 : index
    %11 = vector.load %arg5[%c0_8, %c0_9] : memref<1x128xf32, #tpu.memory_space<vmem>>, vector<1x128xf32>
    %12 = vector.shape_cast %11 : vector<1x128xf32> to vector<128xf32>
    %13 = vector.shape_cast %12 : vector<128xf32> to vector<1x128xf32>
    %14 = vector.broadcast %13 : vector<1x128xf32> to vector<16x128xf32>
    %15 = arith.addf %10, %14 : vector<16x128xf32>
    %16 = math.tanh %15 : vector<16x128xf32>
    %c0_10 = arith.constant 0 : index
    %c0_11 = arith.constant 0 : index
    %17 = vector.load %arg6[%c0_10, %c0_11] : memref<128x128xf32, #tpu.memory_space<vmem>>, vector<128x128xf32>
    %cst_12 = arith.constant dense<0.000000e+00> : vector<16x128xf32>
    %18 = tpu.matmul %16, %17, %cst_12 {dimension_numbers = #tpu.dot_dimension_numbers<[1], [0], [0], [1], [0, 0, 1, 1], [], []>} : vector<16x128xf32>, vector<128x128xf32>, vector<16x128xf32> -> vector<16x128xf32>
    %c0_13 = arith.constant 0 : index
    %c0_14 = arith.constant 0 : index
    %19 = vector.load %arg7[%c0_13, %c0_14] : memref<1x128xf32, #tpu.memory_space<vmem>>, vector<1x128xf32>
    %20 = vector.shape_cast %19 : vector<1x128xf32> to vector<128xf32>
    %21 = vector.shape_cast %20 : vector<128xf32> to vector<1x128xf32>
    %22 = vector.broadcast %21 : vector<1x128xf32> to vector<16x128xf32>
    %23 = arith.addf %18, %22 : vector<16x128xf32>
    %24 = math.tanh %23 : vector<16x128xf32>
    %c0_15 = arith.constant 0 : index
    %c0_16 = arith.constant 0 : index
    %25 = vector.load %arg8[%c0_15, %c0_16] : memref<128x128xf32, #tpu.memory_space<vmem>>, vector<128x128xf32>
    %cst_17 = arith.constant dense<0.000000e+00> : vector<16x128xf32>
    %26 = tpu.matmul %24, %25, %cst_17 {dimension_numbers = #tpu.dot_dimension_numbers<[1], [0], [0], [1], [0, 0, 1, 1], [], []>} : vector<16x128xf32>, vector<128x128xf32>, vector<16x128xf32> -> vector<16x128xf32>
    %c0_18 = arith.constant 0 : index
    %c0_19 = arith.constant 0 : index
    %27 = vector.load %arg9[%c0_18, %c0_19] : memref<1x128xf32, #tpu.memory_space<vmem>>, vector<1x128xf32>
    %28 = vector.shape_cast %27 : vector<1x128xf32> to vector<128xf32>
    %29 = vector.shape_cast %28 : vector<128xf32> to vector<1x128xf32>
    %30 = vector.broadcast %29 : vector<1x128xf32> to vector<16x128xf32>
    %31 = arith.addf %26, %30 : vector<16x128xf32>
    %32 = math.tanh %31 : vector<16x128xf32>
    %c0_20 = arith.constant 0 : index
    %c0_21 = arith.constant 0 : index
    %33 = vector.load %arg10[%c0_20, %c0_21] : memref<128x128xf32, #tpu.memory_space<vmem>>, vector<128x128xf32>
    %cst_22 = arith.constant dense<0.000000e+00> : vector<16x128xf32>
    %34 = tpu.matmul %32, %33, %cst_22 {dimension_numbers = #tpu.dot_dimension_numbers<[1], [0], [0], [1], [0, 0, 1, 1], [], []>} : vector<16x128xf32>, vector<128x128xf32>, vector<16x128xf32> -> vector<16x128xf32>
    %c0_23 = arith.constant 0 : index
    %c0_24 = arith.constant 0 : index
    %35 = vector.load %arg11[%c0_23, %c0_24] : memref<1x128xf32, #tpu.memory_space<vmem>>, vector<1x128xf32>
    %36 = vector.shape_cast %35 : vector<1x128xf32> to vector<128xf32>
    %37 = vector.shape_cast %36 : vector<128xf32> to vector<1x128xf32>
    %38 = vector.broadcast %37 : vector<1x128xf32> to vector<16x128xf32>
    %39 = arith.addf %34, %38 : vector<16x128xf32>
    %40 = math.tanh %39 : vector<16x128xf32>
    %c0_25 = arith.constant 0 : index
    %c0_26 = arith.constant 0 : index
    %41 = vector.load %arg12[%c0_25, %c0_26] : memref<128x128xf32, #tpu.memory_space<vmem>>, vector<128x128xf32>
    %cst_27 = arith.constant dense<0.000000e+00> : vector<16x128xf32>
    %42 = tpu.matmul %40, %41, %cst_27 {dimension_numbers = #tpu.dot_dimension_numbers<[1], [0], [0], [1], [0, 0, 1, 1], [], []>} : vector<16x128xf32>, vector<128x128xf32>, vector<16x128xf32> -> vector<16x128xf32>
    %c0_28 = arith.constant 0 : index
    %c0_29 = arith.constant 0 : index
    %43 = vector.load %arg13[%c0_28, %c0_29] : memref<1x128xf32, #tpu.memory_space<vmem>>, vector<1x128xf32>
    %44 = vector.shape_cast %43 : vector<1x128xf32> to vector<128xf32>
    %45 = vector.shape_cast %44 : vector<128xf32> to vector<1x128xf32>
    %46 = vector.broadcast %45 : vector<1x128xf32> to vector<16x128xf32>
    %47 = arith.addf %42, %46 : vector<16x128xf32>
    %c0_30 = arith.constant 0 : index
    %c0_31 = arith.constant 0 : index
    %48 = vector.load %arg14[%c0_30, %c0_31] : memref<16x128xf32, #tpu.memory_space<vmem>>, vector<16x128xf32>
    tpu.vector_store %arg14[%c0_30, %c0_31], %47 {strides = array<i32>} : memref<16x128xf32, #tpu.memory_space<vmem>>, vector<16x128xf32>,
    return
  }
  func.func @transform_0(%arg0: i32) -> (i32, i32) {
    %c0_i32 = arith.constant 0 : i32
    %c0_i32_0 = arith.constant 0 : i32
    return %arg0, %c0_i32 : i32, i32
  }
  func.func @transform_1(%arg0: i32) -> (i32, i32) {
    %c0_i32 = arith.constant 0 : i32
    %c0_i32_0 = arith.constant 0 : i32
    %c0_i32_1 = arith.constant 0 : i32
    return %c0_i32, %c0_i32_0 : i32, i32
  }
  func.func @transform_2(%arg0: i32) -> (i32, i32) {
    %c0_i32 = arith.constant 0 : i32
    %c0_i32_0 = arith.constant 0 : i32
    %c0_i32_1 = arith.constant 0 : i32
    return %c0_i32, %c0_i32_0 : i32, i32
  }
  func.func @transform_3(%arg0: i32) -> (i32, i32) {
    %c0_i32 = arith.constant 0 : i32
    %c0_i32_0 = arith.constant 0 : i32
    %c0_i32_1 = arith.constant 0 : i32
    return %c0_i32, %c0_i32_0 : i32, i32
  }
  func.func @transform_4(%arg0: i32) -> (i32, i32) {
    %c0_i32 = arith.constant 0 : i32
    %c0_i32_0 = arith.constant 0 : i32
    %c0_i32_1 = arith.constant 0 : i32
    return %c0_i32, %c0_i32_0 : i32, i32
  }
  func.func @transform_5(%arg0: i32) -> (i32, i32) {
    %c0_i32 = arith.constant 0 : i32
    %c0_i32_0 = arith.constant 0 : i32
    %c0_i32_1 = arith.constant 0 : i32
    return %c0_i32, %c0_i32_0 : i32, i32
  }
  func.func @transform_6(%arg0: i32) -> (i32, i32) {
    %c0_i32 = arith.constant 0 : i32
    %c0_i32_0 = arith.constant 0 : i32
    %c0_i32_1 = arith.constant 0 : i32
    return %c0_i32, %c0_i32_0 : i32, i32
  }
  func.func @transform_7(%arg0: i32) -> (i32, i32) {
    %c0_i32 = arith.constant 0 : i32
    %c0_i32_0 = arith.constant 0 : i32
    %c0_i32_1 = arith.constant 0 : i32
    return %c0_i32, %c0_i32_0 : i32, i32
  }
  func.func @transform_8(%arg0: i32) -> (i32, i32) {
    %c0_i32 = arith.constant 0 : i32
    %c0_i32_0 = arith.constant 0 : i32
    %c0_i32_1 = arith.constant 0 : i32
    return %c0_i32, %c0_i32_0 : i32, i32
  }
  func.func @transform_9(%arg0: i32) -> (i32, i32) {
    %c0_i32 = arith.constant 0 : i32
    %c0_i32_0 = arith.constant 0 : i32
    %c0_i32_1 = arith.constant 0 : i32
    return %c0_i32, %c0_i32_0 : i32, i32
  }
  func.func @transform_10(%arg0: i32) -> (i32, i32) {
    %c0_i32 = arith.constant 0 : i32
    %c0_i32_0 = arith.constant 0 : i32
    %c0_i32_1 = arith.constant 0 : i32
    return %c0_i32, %c0_i32_0 : i32, i32
  }
  func.func @transform_11(%arg0: i32) -> (i32, i32) {
    %c0_i32 = arith.constant 0 : i32
    %c0_i32_0 = arith.constant 0 : i32
    %c0_i32_1 = arith.constant 0 : i32
    return %c0_i32, %c0_i32_0 : i32, i32
  }
  func.func @transform_12(%arg0: i32) -> (i32, i32) {
    %c0_i32 = arith.constant 0 : i32
    %c0_i32_0 = arith.constant 0 : i32
    %c0_i32_1 = arith.constant 0 : i32
    return %c0_i32, %c0_i32_0 : i32, i32
  }
  func.func @transform_13(%arg0: i32) -> (i32, i32) {
    %c0_i32 = arith.constant 0 : i32
    %c0_i32_0 = arith.constant 0 : i32
    return %arg0, %c0_i32 : i32, i32
  }
}

module attributes {stable_mosaic.version = 11 : i64} {
  func.func @mlp_kernel(%arg0: i32, %arg1: memref<16x128xf32, #tpu.memory_space<vmem>>, %arg2: memref<128x128xf32, #tpu.memory_space<vmem>>, %arg3: memref<1x128xf32, #tpu.memory_space<vmem>>, %arg4: memref<128x128xf32, #tpu.memory_space<vmem>>, %arg5: memref<1x128xf32, #tpu.memory_space<vmem>>, %arg6: memref<128x128xf32, #tpu.memory_space<vmem>>, %arg7: memref<1x128xf32, #tpu.memory_space<vmem>>, %arg8: memref<128x128xf32, #tpu.memory_space<vmem>>, %arg9: memref<1x128xf32, #tpu.memory_space<vmem>>, %arg10: memref<128x128xf32, #tpu.memory_space<vmem>>, %arg11: memref<1x128xf32, #tpu.memory_space<vmem>>, %arg12: memref<128x128xf32, #tpu.memory_space<vmem>>, %arg13: memref<1x128xf32, #tpu.memory_space<vmem>>, %arg14: memref<16x128xf32, #tpu.memory_space<vmem>>) attributes {dimension_semantics = [#tpu.dimension_semantics<parallel>], iteration_bounds = array<i64: 1>, scalar_prefetch = 0 : i64, scratch_operands = 0 : i64, tpu.core_type = #tpu.core_type<tc>, window_params = [{transform_indices = @transform_0, window_bounds = array<i64: 16, 128>}, {pipeline_mode = #tpu.pipeline_mode<synchronous>, transform_indices = @transform_1, window_bounds = array<i64: 128, 128>}, {pipeline_mode = #tpu.pipeline_mode<synchronous>, transform_indices = @transform_2, window_bounds = array<i64: 1, 128>}, {pipeline_mode = #tpu.pipeline_mode<synchronous>, transform_indices = @transform_3, window_bounds = array<i64: 128, 128>}, {pipeline_mode = #tpu.pipeline_mode<synchronous>, transform_indices = @transform_4, window_bounds = array<i64: 1, 128>}, {pipeline_mode = #tpu.pipeline_mode<synchronous>, transform_indices = @transform_5, window_bounds = array<i64: 128, 128>}, {pipeline_mode = #tpu.pipeline_mode<synchronous>, transform_indices = @transform_6, window_bounds = array<i64: 1, 128>}, {pipeline_mode = #tpu.pipeline_mode<synchronous>, transform_indices = @transform_7, window_bounds = array<i64: 128, 128>}, {pipeline_mode = #tpu.pipeline_mode<synchronous>, transform_indices = @transform_8, window_bounds = array<i64: 1, 128>}, {pipeline_mode = #tpu.pipeline_mode<synchronous>, transform_indices = @transform_9, window_bounds = array<i64: 128, 128>}, {pipeline_mode = #tpu.pipeline_mode<synchronous>, transform_indices = @transform_10, window_bounds = array<i64: 1, 128>}, {pipeline_mode = #tpu.pipeline_mode<synchronous>, transform_indices = @transform_11, window_bounds = array<i64: 128, 128>}, {pipeline_mode = #tpu.pipeline_mode<synchronous>, transform_indices = @transform_12, window_bounds = array<i64: 1, 128>}, {transform_indices = @transform_13, window_bounds = array<i64: 16, 128>}]} {
    %c0 = arith.constant 0 : index
    %c0_0 = arith.constant 0 : index
    %0 = vector.load %arg1[%c0, %c0_0] : memref<16x128xf32, #tpu.memory_space<vmem>>, vector<16x128xf32>
    %c0_1 = arith.constant 0 : index
    %c0_2 = arith.constant 0 : index
    %1 = vector.load %arg2[%c0_1, %c0_2] : memref<128x128xf32, #tpu.memory_space<vmem>>, vector<128x128xf32>
    %cst = arith.constant dense<0.000000e+00> : vector<16x128xf32>
    %2 = tpu.matmul %0, %1, %cst {dimension_numbers = #tpu.dot_dimension_numbers<[1], [0], [0], [1], [0, 0, 1, 1], [], []>} : vector<16x128xf32>, vector<128x128xf32>, vector<16x128xf32> -> vector<16x128xf32>
    %c0_3 = arith.constant 0 : index
    %c0_4 = arith.constant 0 : index
    %3 = vector.load %arg3[%c0_3, %c0_4] : memref<1x128xf32, #tpu.memory_space<vmem>>, vector<1x128xf32>
    %4 = vector.shape_cast %3 : vector<1x128xf32> to vector<128xf32>
    %5 = vector.shape_cast %4 : vector<128xf32> to vector<1x128xf32>
    %6 = vector.broadcast %5 : vector<1x128xf32> to vector<16x128xf32>
    %7 = arith.addf %2, %6 : vector<16x128xf32>
    %8 = math.tanh %7 : vector<16x128xf32>
    %c0_5 = arith.constant 0 : index
    %c0_6 = arith.constant 0 : index
    %9 = vector.load %arg4[%c0_5, %c0_6] : memref<128x128xf32, #tpu.memory_space<vmem>>, vector<128x128xf32>
    %cst_7 = arith.constant dense<0.000000e+00> : vector<16x128xf32>
    %10 = tpu.matmul %8, %9, %cst_7 {dimension_numbers = #tpu.dot_dimension_numbers<[1], [0], [0], [1], [0, 0, 1, 1], [], []>} : vector<16x128xf32>, vector<128x128xf32>, vector<16x128xf32> -> vector<16x128xf32>
    %c0_8 = arith.constant 0 : index
    %c0_9 = arith.constant 0 : index
    %11 = vector.load %arg5[%c0_8, %c0_9] : memref<1x128xf32, #tpu.memory_space<vmem>>, vector<1x128xf32>
    %12 = vector.shape_cast %11 : vector<1x128xf32> to vector<128xf32>
    %13 = vector.shape_cast %12 : vector<128xf32> to vector<1x128xf32>
    %14 = vector.broadcast %13 : vector<1x128xf32> to vector<16x128xf32>
    %15 = arith.addf %10, %14 : vector<16x128xf32>
    %16 = math.tanh %15 : vector<16x128xf32>
    %c0_10 = arith.constant 0 : index
    %c0_11 = arith.constant 0 : index
    %17 = vector.load %arg6[%c0_10, %c0_11] : memref<128x128xf32, #tpu.memory_space<vmem>>, vector<128x128xf32>
    %cst_12 = arith.constant dense<0.000000e+00> : vector<16x128xf32>
    %18 = tpu.matmul %16, %17, %cst_12 {dimension_numbers = #tpu.dot_dimension_numbers<[1], [0], [0], [1], [0, 0, 1, 1], [], []>} : vector<16x128xf32>, vector<128x128xf32>, vector<16x128xf32> -> vector<16x128xf32>
    %c0_13 = arith.constant 0 : index
    %c0_14 = arith.constant 0 : index
    %19 = vector.load %arg7[%c0_13, %c0_14] : memref<1x128xf32, #tpu.memory_space<vmem>>, vector<1x128xf32>
    %20 = vector.shape_cast %19 : vector<1x128xf32> to vector<128xf32>
    %21 = vector.shape_cast %20 : vector<128xf32> to vector<1x128xf32>
    %22 = vector.broadcast %21 : vector<1x128xf32> to vector<16x128xf32>
    %23 = arith.addf %18, %22 : vector<16x128xf32>
    %24 = math.tanh %23 : vector<16x128xf32>
    %c0_15 = arith.constant 0 : index
    %c0_16 = arith.constant 0 : index
    %25 = vector.load %arg8[%c0_15, %c0_16] : memref<128x128xf32, #tpu.memory_space<vmem>>, vector<128x128xf32>
    %cst_17 = arith.constant dense<0.000000e+00> : vector<16x128xf32>
    %26 = tpu.matmul %24, %25, %cst_17 {dimension_numbers = #tpu.dot_dimension_numbers<[1], [0], [0], [1], [0, 0, 1, 1], [], []>} : vector<16x128xf32>, vector<128x128xf32>, vector<16x128xf32> -> vector<16x128xf32>
    %c0_18 = arith.constant 0 : index
    %c0_19 = arith.constant 0 : index
    %27 = vector.load %arg9[%c0_18, %c0_19] : memref<1x128xf32, #tpu.memory_space<vmem>>, vector<1x128xf32>
    %28 = vector.shape_cast %27 : vector<1x128xf32> to vector<128xf32>
    %29 = vector.shape_cast %28 : vector<128xf32> to vector<1x128xf32>
    %30 = vector.broadcast %29 : vector<1x128xf32> to vector<16x128xf32>
    %31 = arith.addf %26, %30 : vector<16x128xf32>
    %32 = math.tanh %31 : vector<16x128xf32>
    %c0_20 = arith.constant 0 : index
    %c0_21 = arith.constant 0 : index
    %33 = vector.load %arg10[%c0_20, %c0_21] : memref<128x128xf32, #tpu.memory_space<vmem>>, vector<128x128xf32>
    %cst_22 = arith.constant dense<0.000000e+00> : vector<16x128xf32>
    %34 = tpu.matmul %32, %33, %cst_22 {dimension_numbers = #tpu.dot_dimension_numbers<[1], [0], [0], [1], [0, 0, 1, 1], [], []>} : vector<16x128xf32>, vector<128x128xf32>, vector<16x128xf32> -> vector<16x128xf32>
    %c0_23 = arith.constant 0 : index
    %c0_24 = arith.constant 0 : index
    %35 = vector.load %arg11[%c0_23, %c0_24] : memref<1x128xf32, #tpu.memory_space<vmem>>, vector<1x128xf32>
    %36 = vector.shape_cast %35 : vector<1x128xf32> to vector<128xf32>
    %37 = vector.shape_cast %36 : vector<128xf32> to vector<1x128xf32>
    %38 = vector.broadcast %37 : vector<1x128xf32> to vector<16x128xf32>
    %39 = arith.addf %34, %38 : vector<16x128xf32>
    %40 = math.tanh %39 : vector<16x128xf32>
    %c0_25 = arith.constant 0 : index
    %c0_26 = arith.constant 0 : index
    %41 = vector.load %arg12[%c0_25, %c0_26] : memref<128x128xf32, #tpu.memory_space<vmem>>, vector<128x128xf32>
    %cst_27 = arith.constant dense<0.000000e+00> : vector<16x128xf32>
    %42 = tpu.matmul %40, %41, %cst_27 {dimension_numbers = #tpu.dot_dimension_numbers<[1], [0], [0], [1], [0, 0, 1, 1], [], []>} : vector<16x128xf32>, vector<128x128xf32>, vector<16x128xf32> -> vector<16x128xf32>
    %c0_28 = arith.constant 0 : index
    %c0_29 = arith.constant 0 : index
    %43 = vector.load %arg13[%c0_28, %c0_29] : memref<1x128xf32, #tpu.memory_space<vmem>>, vector<1x128xf32>
    %44 = vector.shape_cast %43 : vector<1x128xf32> to vector<128xf32>
    %45 = vector.shape_cast %44 : vector<128xf32> to vector<1x128xf32>
    %46 = vector.broadcast %45 : vector<1x128xf32> to vector<16x128xf32>
    %47 = arith.addf %42, %46 : vector<16x128xf32>
    %c0_30 = arith.constant 0 : index
    %c0_31 = arith.constant 0 : index
    %48 = vector.load %arg14[%c0_30, %c0_31] : memref<16x128xf32, #tpu.memory_space<vmem>>, vector<16x128xf32>
    tpu.vector_store %arg14[%c0_30, %c0_31], %47 {strides = array<i32>} : memref<16x128xf32, #tpu.memory_space<vmem>>, vector<16x128xf32>,
    return
  }
  func.func @transform_0(%arg0: i32) -> (i32, i32) {
    %c0_i32 = arith.constant 0 : i32
    %c0_i32_0 = arith.constant 0 : i32
    return %arg0, %c0_i32 : i32, i32
  }
  func.func @transform_1(%arg0: i32) -> (i32, i32) {
    %c0_i32 = arith.constant 0 : i32
    %c0_i32_0 = arith.constant 0 : i32
    %c0_i32_1 = arith.constant 0 : i32
    return %c0_i32, %c0_i32_0 : i32, i32
  }
  func.func @transform_2(%arg0: i32) -> (i32, i32) {
    %c0_i32 = arith.constant 0 : i32
    %c0_i32_0 = arith.constant 0 : i32
    %c0_i32_1 = arith.constant 0 : i32
    return %c0_i32, %c0_i32_0 : i32, i32
  }
  func.func @transform_3(%arg0: i32) -> (i32, i32) {
    %c0_i32 = arith.constant 0 : i32
    %c0_i32_0 = arith.constant 0 : i32
    %c0_i32_1 = arith.constant 0 : i32
    return %c0_i32, %c0_i32_0 : i32, i32
  }
  func.func @transform_4(%arg0: i32) -> (i32, i32) {
    %c0_i32 = arith.constant 0 : i32
    %c0_i32_0 = arith.constant 0 : i32
    %c0_i32_1 = arith.constant 0 : i32
    return %c0_i32, %c0_i32_0 : i32, i32
  }
  func.func @transform_5(%arg0: i32) -> (i32, i32) {
    %c0_i32 = arith.constant 0 : i32
    %c0_i32_0 = arith.constant 0 : i32
    %c0_i32_1 = arith.constant 0 : i32
    return %c0_i32, %c0_i32_0 : i32, i32
  }
  func.func @transform_6(%arg0: i32) -> (i32, i32) {
    %c0_i32 = arith.constant 0 : i32
    %c0_i32_0 = arith.constant 0 : i32
    %c0_i32_1 = arith.constant 0 : i32
    return %c0_i32, %c0_i32_0 : i32, i32
  }
  func.func @transform_7(%arg0: i32) -> (i32, i32) {
    %c0_i32 = arith.constant 0 : i32
    %c0_i32_0 = arith.constant 0 : i32
    %c0_i32_1 = arith.constant 0 : i32
    return %c0_i32, %c0_i32_0 : i32, i32
  }
  func.func @transform_8(%arg0: i32) -> (i32, i32) {
    %c0_i32 = arith.constant 0 : i32
    %c0_i32_0 = arith.constant 0 : i32
    %c0_i32_1 = arith.constant 0 : i32
    return %c0_i32, %c0_i32_0 : i32, i32
  }
  func.func @transform_9(%arg0: i32) -> (i32, i32) {
    %c0_i32 = arith.constant 0 : i32
    %c0_i32_0 = arith.constant 0 : i32
    %c0_i32_1 = arith.constant 0 : i32
    return %c0_i32, %c0_i32_0 : i32, i32
  }
  func.func @transform_10(%arg0: i32) -> (i32, i32) {
    %c0_i32 = arith.constant 0 : i32
    %c0_i32_0 = arith.constant 0 : i32
    %c0_i32_1 = arith.constant 0 : i32
    return %c0_i32, %c0_i32_0 : i32, i32
  }
  func.func @transform_11(%arg0: i32) -> (i32, i32) {
    %c0_i32 = arith.constant 0 : i32
    %c0_i32_0 = arith.constant 0 : i32
    %c0_i32_1 = arith.constant 0 : i32
    return %c0_i32, %c0_i32_0 : i32, i32
  }
  func.func @transform_12(%arg0: i32) -> (i32, i32) {
    %c0_i32 = arith.constant 0 : i32
    %c0_i32_0 = arith.constant 0 : i32
    %c0_i32_1 = arith.constant 0 : i32
    return %c0_i32, %c0_i32_0 : i32, i32
  }
  func.func @transform_13(%arg0: i32) -> (i32, i32) {
    %c0_i32 = arith.constant 0 : i32
    %c0_i32_0 = arith.constant 0 : i32
    return %arg0, %c0_i32 : i32, i32
  }
}

</mosaic_0001>

<bundles_post_ra>
// kernel: tpu_custom_call.1
= control target key start
LH: loop header
LB: loop body
LE: loop exit
PB: predicated region body
PF: predicated region fallthrough
CT: control target
= control target key end

     0   :  { %18 = vsyncpa [#allocation3], 0  ;;  %s1733_s0 = inlined_call_operand.hbm [shape: f32[16,128], index: 0, kind: input, shape index: {}]   ;;  %s1734_s1 = inlined_call_operand.hbm [shape: f32[128,128], index: 1, kind: input, shape index: {}]   ;;  %s1735_s2 = inlined_call_operand.vmem [shape: f32[1,128], index: 2, kind: input, shape index: {}]   ;;  %s1736_s3 = inlined_call_operand.hbm [shape: f32[128,128], index: 3, kind: input, shape index: {}]   ;;  %s1737_s4 = inlined_call_operand.vmem [shape: f32[1,128], index: 4, kind: input, shape index: {}]   ;;  %s1738_s5 = inlined_call_operand.hbm [shape: f32[128,128], index: 5, kind: input, shape index: {}]   ;;  %s1739_s6 = inlined_call_operand.vmem [shape: f32[1,128], index: 6, kind: input, shape index: {}]   ;;  %s1740_s7 = inlined_call_operand.hbm [shape: f32[128,128], index: 7, kind: input, shape index: {}]   ;;  %s1741_s8 = inlined_call_operand.vmem [shape: f32[1,128], index: 8, kind: input, shape index: {}]   ;;  %s1742_s9 = inlined_call_operand.hbm [shape: f32[128,128], index: 9, kind: input, shape index: {}]   ;;  %s1743_s10 = inlined_call_operand.vmem [shape: f32[1,128], index: 10, kind: input, shape index: {}]   ;;  %s1744_s11 = inlined_call_operand.hbm [shape: f32[128,128], index: 11, kind: input, shape index: {}]   ;;  %s1745_s12 = inlined_call_operand.vmem [shape: f32[1,128], index: 12, kind: input, shape index: {}]   ;;  %s1746_s13 = inlined_call_operand.hbm [shape: f32[16,128], index: 13, kind: output, shape index: {}]  }
   0x1   :  { %19 = vsyncpa [#allocation6], 0 }
   0x2   :  { %20 = vsyncpa [#allocation9], 0 }
   0x3   :  { %21 = vsyncpa [#allocation12], 0 }
   0x4   :  { %22 = vsyncpa [#allocation4], 0  ;;  %s1494_s25 = smov [#allocation5]   ;;  %s1495_s27 = smov [#allocation8]  }
   0x5   :  { %s40_s26 = sshll.u32 %s1494_s25, 4  ;;  %s68_s28 = sshll.u32 %s1495_s27, 4  ;;  %s41_s26 = int_to_ptr.vmem [resolvable:$true] %s40_s26  ;;  %s1574_s28 = int_to_ptr.vmem [resolvable:$true] %s68_s28 }
   0x6   :  { %s1308_s14 = scalar_lea.hbm %s1734_s1, 2048 }
   0x7   :  { %p1309_p0 = scmp.ne.s32.totalorder %s1734_s1, %s1308_s14  ;;  %p1312_p1 = scmp.lt.u32.totalorder %s1308_s14, %s1734_s1 }
   0x9   :  { %p1314_p2 = pnand %p1312_p1, %p1309_p0 }
   0xb   :  { %1317 = shalt.err (!%p1314_p2)
}
   0xc   :  { %s1318_s19 = scalar_lea.vmem %s41_s26, 2048  ;;  %p1323_p4 = scmp.lt.s32.totalorder %s41_s26, %s41_s26 }
   0xd   :  { %p1319_p3 = scmp.ne.s32.totalorder %s41_s26, %s1318_s19  ;;  %p1324_p5 = scmp.lt.s32.totalorder %s1318_s19, %s1318_s19 }
   0xf   :  { %p1325_p6 = por %p1324_p5, %p1323_p4 }
  0x11   :  { %p1326_p7 = pnand %p1325_p6, %p1319_p3 }
  0x13   :  { %1329 = shalt.err (!%p1326_p7)
}
  0x14   :  { %s1496_s20 = smov 128   ;;  %s1497_s21 = smov 8  }
  0x15   :  { %46 = dma.hbm_to_vmem [thread:$0]  %s1734_s1, 2048, %s41_s26, [#allocation6], %s1496_s20, %s1496_s20, %s1497_s21  }
  0x16   :  { %s1330_s27 = scalar_lea.hbm %s1738_s5, 2048 }
  0x17   :  { %p1331_p8 = scmp.ne.s32.totalorder %s1738_s5, %s1330_s27  ;;  %p1334_p9 = scmp.lt.u32.totalorder %s1330_s27, %s1738_s5 }
  0x19   :  { %p1336_p10 = pnand %p1334_p9, %p1331_p8 }
  0x1b   :  { %1339 = shalt.err (!%p1336_p10)
}
  0x1c   :  { %s1340_s16 = scalar_lea.vmem %s1574_s28, 2048  ;;  %p1345_p12 = scmp.lt.s32.totalorder %s1574_s28, %s1574_s28 }
  0x1d   :  { %p1341_p11 = scmp.ne.s32.totalorder %s1574_s28, %s1340_s16  ;;  %p1346_p13 = scmp.lt.s32.totalorder %s1340_s16, %s1340_s16 }
  0x1f   :  { %p1347_p0 = por %p1346_p13, %p1345_p12 }
  0x21   :  { %p1348_p1 = pnand %p1347_p0, %p1341_p11 }
  0x23   :  { %1351 = shalt.err (!%p1348_p1)
}
  0x24   :  { %74 = dma.hbm_to_vmem [thread:$0]  %s1738_s5, 2048, %s1574_s28, [#allocation9], %s1496_s20, %s1496_s20, %s1497_s21  }
  0x25   :  { %s1498_s17 = smov [#allocation11]   ;;  %s1499_s19 = smov [#allocation2]  }
  0x26   :  { %s96_s18 = sshll.u32 %s1498_s17, 4  ;;  %s28_s22 = sshll.u32 %s1499_s19, 4  ;;  %s97_s18 = int_to_ptr.vmem [resolvable:$true] %s96_s18  ;;  %s1611_s22 = int_to_ptr.vmem [resolvable:$true] %s28_s22 }
  0x27   :  { %s1352_s25 = scalar_lea.hbm %s1742_s9, 2048 }
  0x28   :  { %p1353_p2 = scmp.ne.s32.totalorder %s1742_s9, %s1352_s25  ;;  %p1356_p3 = scmp.lt.u32.totalorder %s1352_s25, %s1742_s9 }
  0x2a   :  { %p1358_p4 = pnand %p1356_p3, %p1353_p2 }
  0x2c   :  { %1361 = shalt.err (!%p1358_p4)
}
  0x2d   :  { %s1362_s5 = scalar_lea.vmem %s97_s18, 2048  ;;  %p1367_p6 = scmp.lt.s32.totalorder %s97_s18, %s97_s18 }
  0x2e   :  { %p1363_p5 = scmp.ne.s32.totalorder %s97_s18, %s1362_s5  ;;  %p1368_p7 = scmp.lt.s32.totalorder %s1362_s5, %s1362_s5 }
  0x30   :  { %p1369_p8 = por %p1368_p7, %p1367_p6 }
  0x32   :  { %p1370_p9 = pnand %p1369_p8, %p1363_p5 }
  0x34   :  { %1373 = shalt.err (!%p1370_p9)
}
  0x35   :  { %102 = dma.hbm_to_vmem [thread:$0]  %s1742_s9, 2048, %s97_s18, [#allocation12], %s1496_s20, %s1496_s20, %s1497_s21  }
  0x36   :  { %s1374_s26 = scalar_lea.hbm %s1733_s0, 256 }
  0x37   :  { %p1375_p10 = scmp.ne.s32.totalorder %s1733_s0, %s1374_s26  ;;  %p1378_p11 = scmp.lt.u32.totalorder %s1374_s26, %s1733_s0 }
  0x39   :  { %p1380_p12 = pnand %p1378_p11, %p1375_p10 }
  0x3b   :  { %1383 = shalt.err (!%p1380_p12)
}
  0x3c   :  { %s1384_s25 = scalar_lea.vmem %s1611_s22, 256  ;;  %p1389_p0 = scmp.lt.s32.totalorder %s1611_s22, %s1611_s22 }
  0x3d   :  { %p1385_p13 = scmp.ne.s32.totalorder %s1611_s22, %s1384_s25  ;;  %p1390_p1 = scmp.lt.s32.totalorder %s1384_s25, %s1384_s25 }
  0x3f   :  { %p1391_p2 = por %p1390_p1, %p1389_p0 }
  0x41   :  { %p1392_p3 = pnand %p1391_p2, %p1385_p13 }
  0x43   :  { %1395 = shalt.err (!%p1392_p3)
}
  0x44   :  { %34 = dma.hbm_to_vmem [thread:$0]  %s1733_s0, 256, %s1611_s22, [#allocation3], %s1496_s20, %s1496_s20, %s1497_s21  }
  0x45   :  { %s1500_s27 = smov [#allocation7]   ;;  %s1501_s30 = smov [#allocation10]  }
  0x46   :  { %s54_s29 = sshll.u32 %s1500_s27, 4  ;;  %s82_s14 = sshll.u32 %s1501_s30, 4  ;;  %s55_s29 = int_to_ptr.vmem [resolvable:$true] %s54_s29  ;;  %s1648_s14 = int_to_ptr.vmem [resolvable:$true] %s82_s14 }
  0x47   :  { %s1396_s15 = scalar_lea.hbm %s1736_s3, 2048 }
  0x48   :  { %p1397_p4 = scmp.ne.s32.totalorder %s1736_s3, %s1396_s15  ;;  %p1400_p5 = scmp.lt.u32.totalorder %s1396_s15, %s1736_s3 }
  0x4a   :  { %p1402_p6 = pnand %p1400_p5, %p1397_p4 }
  0x4c   :  { %1405 = shalt.err (!%p1402_p6)
}
  0x4d   :  { %s1406_s0 = scalar_lea.vmem %s55_s29, 2048  ;;  %p1411_p8 = scmp.lt.s32.totalorder %s55_s29, %s55_s29 }
  0x4e   :  { %p1407_p7 = scmp.ne.s32.totalorder %s55_s29, %s1406_s0  ;;  %p1412_p9 = scmp.lt.s32.totalorder %s1406_s0, %s1406_s0 }
  0x50   :  { %p1413_p10 = por %p1412_p9, %p1411_p8 }
  0x52   :  { %p1414_p11 = pnand %p1413_p10, %p1407_p7 }
  0x54   :  { %1417 = shalt.err (!%p1414_p11)
}
  0x55   :  { %60 = dma.hbm_to_vmem [thread:$0]  %s1736_s3, 2048, %s55_s29, [#allocation6], %s1496_s20, %s1496_s20, %s1497_s21  }
  0x56   :  { %s1418_s25 = scalar_lea.hbm %s1740_s7, 2048 }
  0x57   :  { %p1419_p12 = scmp.ne.s32.totalorder %s1740_s7, %s1418_s25  ;;  %p1422_p13 = scmp.lt.u32.totalorder %s1418_s25, %s1740_s7 }
  0x59   :  { %p1424_p0 = pnand %p1422_p13, %p1419_p12 }
  0x5b   :  { %1427 = shalt.err (!%p1424_p0)
}
  0x5c   :  { %s1428_s5 = scalar_lea.vmem %s1648_s14, 2048  ;;  %p1433_p2 = scmp.lt.s32.totalorder %s1648_s14, %s1648_s14 }
  0x5d   :  { %p1429_p1 = scmp.ne.s32.totalorder %s1648_s14, %s1428_s5  ;;  %p1434_p3 = scmp.lt.s32.totalorder %s1428_s5, %s1428_s5 }
  0x5f   :  { %p1435_p4 = por %p1434_p3, %p1433_p2 }
  0x61   :  { %p1436_p5 = pnand %p1435_p4, %p1429_p1 }
  0x63   :  { %1439 = shalt.err (!%p1436_p5)
}
  0x64   :  { %88 = dma.hbm_to_vmem [thread:$0]  %s1740_s7, 2048, %s1648_s14, [#allocation9], %s1496_s20, %s1496_s20, %s1497_s21  }
  0x65   :  { %s1502_s28 = smov [#allocation13]   ;;  %s1440_s26 = scalar_lea.hbm %s1744_s11, 2048 }
  0x66   :  { %s110_s15 = sshll.u32 %s1502_s28, 4  ;;  %p1441_p6 = scmp.ne.s32.totalorder %s1744_s11, %s1440_s26  ;;  %s111_s15 = int_to_ptr.vmem [resolvable:$true] %s110_s15 }
  0x67   :  { %p1444_p7 = scmp.lt.u32.totalorder %s1440_s26, %s1744_s11 }
  0x69   :  { %p1446_p8 = pnand %p1444_p7, %p1441_p6 }
  0x6b   :  { %1449 = shalt.err (!%p1446_p8)
}
  0x6c   :  { %s1450_s23 = scalar_lea.vmem %s111_s15, 2048  ;;  %p1455_p10 = scmp.lt.s32.totalorder %s111_s15, %s111_s15 }
  0x6d   :  { %p1451_p9 = scmp.ne.s32.totalorder %s111_s15, %s1450_s23  ;;  %p1456_p11 = scmp.lt.s32.totalorder %s1450_s23, %s1450_s23 }
  0x6f   :  { %p1457_p12 = por %p1456_p11, %p1455_p10 }
  0x71   :  { %p1458_p13 = pnand %p1457_p12, %p1451_p9 }
  0x73   :  { %1461 = shalt.err (!%p1458_p13)
}
  0x74   :  { %116 = dma.hbm_to_vmem [thread:$0]  %s1744_s11, 2048, %s111_s15, [#allocation12], %s1496_s20, %s1496_s20, %s1497_s21  }
  0x75   :  { %1484 = dma.done.wait [#allocation3], 256  }
  0x76   :  { %1485 = vsyncadd [#allocation3], 4294967040 }
  0x77   :  { %1486 = dma.done.wait [#allocation6], 4096  }
  0x78   :  { %1487 = vsyncadd [#allocation6], 4294963200 }
  0x79   :  { %1488 = dma.done.wait [#allocation9], 4096  }
  0x7a   :  { %1489 = vsyncadd [#allocation9], 4294963200 }
  0x7b   :  { %1490 = dma.done.wait [#allocation12], 4096  }
  0x7c   :  { %1491 = vsyncadd [#allocation12], 4294963200  ;;  %v142_v0 = vld [vmem:[#allocation5] sm:$0xff]  ;;  %v143_v1 = vld [vmem:[#allocation5 + $0x8] sm:$0xff]  ;;  %s1503_s3 = smov [#allocation14]  }
  0x7d   :  { %v144_v2 = vld [vmem:[#allocation5 + $0x10] sm:$0xff]  ;;  %v1086_v3 = vpack.c.bf16 %v143_v1, %v142_v0  ;;  %v145_v4 = vld [vmem:[#allocation5 + $0x18] sm:$0xff]  ;;  %v146_v6 = vld [vmem:[#allocation5 + $0x20] sm:$0xff]  ;;  %s747_s29 = sshll.u32 %s1503_s3, 4  ;;  %s748_s29 = int_to_ptr.vmem [resolvable:$true] %s747_s29 }
  0x7e   :  { %v1090_v5 = vpack.c.bf16 %v145_v4, %v144_v2  ;;  %v147_v7 = vld [vmem:[#allocation5 + $0x28] sm:$0xff]  ;;  %v148_v9 = vld [vmem:[#allocation5 + $0x30] sm:$0xff]  ;;  %v149_v10 = vld [vmem:[#allocation5 + $0x38] sm:$0xff]  ;;  %p1467_p1 = scmp.lt.s32.totalorder %s748_s29, %s748_s29 }
  0x7f   :  { %1087 = vmatprep.subr.bf16.mxu0 %v1086_v3  ;;  %v1094_v8 = vpack.c.bf16 %v147_v7, %v146_v6  ;;  %v140_v11 = vld [vmem:[#allocation2] sm:$0xff]  ;;  %v242_v12 = vld [vmem:[#allocation7] sm:$0xff]  ;;  %v243_v13 = vld [vmem:[#allocation7 + $0x8] sm:$0xff]  ;;  %v1098_v20 = vpack.c.bf16 %v149_v10, %v148_v9 }
  0x80   :  { %1089 = vmatpush3.bf16.msra.mxu0 %v1086_v3  ;;  %908 = vmatprep.mubr.f32.mxu0 %v140_v11  ;;  %v244_v14 = vld [vmem:[#allocation7 + $0x10] sm:$0xff]  ;;  %v1118_v15 = vpack.c.bf16 %v243_v13, %v242_v12  ;;  %v245_v16 = vld [vmem:[#allocation7 + $0x18] sm:$0xff]  ;;  %v246_v18 = vld [vmem:[#allocation7 + $0x20] sm:$0xff] }
  0x81   :  { %1091 = vmatprep.subr.bf16.mxu0 %v1090_v5  ;;  %v1122_v17 = vpack.c.bf16 %v245_v16, %v244_v14  ;;  %v247_v19 = vld [vmem:[#allocation7 + $0x28] sm:$0xff]  ;;  %v150_v21 = vld [vmem:[#allocation5 + $0x40] sm:$0xff]  ;;  %v248_v24 = vld [vmem:[#allocation7 + $0x30] sm:$0xff] }
  0x82   :  { %1119 = vmatprep.subr.bf16.mxu1 %v1118_v15  ;;  %v151_v22 = vld [vmem:[#allocation5 + $0x48] sm:$0xff]  ;;  %v1126_v23 = vpack.c.bf16 %v247_v19, %v246_v18  ;;  %v249_v25 = vld [vmem:[#allocation7 + $0x38] sm:$0xff]  ;;  %v152_v27 = vld [vmem:[#allocation5 + $0x50] sm:$0xff] }
  0x83   :  { %1121 = vmatpush3.bf16.msra.mxu1 %v1118_v15  ;;  %v1102_v26 = vpack.c.bf16 %v151_v22, %v150_v21  ;;  %v153_v28 = vld [vmem:[#allocation5 + $0x58] sm:$0xff]  ;;  %v1130_v29 = vpack.c.bf16 %v249_v25, %v248_v24  ;;  %v154_v31 = vld [vmem:[#allocation5 + $0x60] sm:$0xff]  ;;  %v155_v32 = vld [vmem:[#allocation5 + $0x68] sm:$0xff] }
  0x84   :  { %1093 = vmatpush3.bf16.msra.mxu0 %v1090_v5  ;;  %1123 = vmatprep.subr.bf16.mxu1 %v1122_v17  ;;  %v1106_v30 = vpack.c.bf16 %v153_v28, %v152_v27  ;;  %v1110_v33 = vpack.c.bf16 %v155_v32, %v154_v31  ;;  %v156_v34 = vld [vmem:[#allocation5 + $0x70] sm:$0xff]  ;;  %v157_v35 = vld [vmem:[#allocation5 + $0x78] sm:$0xff]  ;;  %v250_v38 = vld [vmem:[#allocation7 + $0x40] sm:$0xff] }
  0x85   :  { %1095 = vmatprep.subr.bf16.mxu0 %v1094_v8  ;;  %v1114_v36 = vpack.c.bf16 %v157_v35, %v156_v34  ;;  %v141_v37 = vld [vmem:[#allocation2 + $0x8] sm:$0xff]  ;;  %v251_v39 = vld [vmem:[#allocation7 + $0x48] sm:$0xff]  ;;  %v252_v41 = vld [vmem:[#allocation7 + $0x50] sm:$0xff] }
  0x86   :  { %v1134_v40 = vpack.c.bf16 %v251_v39, %v250_v38  ;;  %v253_v42 = vld [vmem:[#allocation7 + $0x58] sm:$0xff]  ;;  %v254_v44 = vld [vmem:[#allocation7 + $0x60] sm:$0xff]  ;;  %v255_v45 = vld [vmem:[#allocation7 + $0x68] sm:$0xff] }
  0x87   :  { %1125 = vmatpush3.bf16.msra.mxu1 %v1122_v17  ;;  %v1138_v43 = vpack.c.bf16 %v253_v42, %v252_v41  ;;  %v256_v46 = vld [vmem:[#allocation7 + $0x70] sm:$0xff]  ;;  %v1142_v47 = vpack.c.bf16 %v255_v45, %v254_v44  ;;  %v257_v48 = vld [vmem:[#allocation7 + $0x78] sm:$0xff]  ;;  %v342_v50 = vld [vmem:[#allocation8] sm:$0xff] }
  0x88   :  { %1097 = vmatpush3.bf16.msra.mxu0 %v1094_v8  ;;  %1127 = vmatprep.subr.bf16.mxu1 %v1126_v23  ;;  %v1146_v49 = vpack.c.bf16 %v257_v48, %v256_v46  ;;  %v343_v51 = vld [vmem:[#allocation8 + $0x8] sm:$0xff]  ;;  %v344_v52 = vld [vmem:[#allocation8 + $0x10] sm:$0xff]  ;;  %v345_v54 = vld [vmem:[#allocation8 + $0x18] sm:$0xff] }
  0x89   :  { %1099 = vmatprep.subr.bf16.mxu0 %v1098_v20  ;;  %v1150_v53 = vpack.c.bf16 %v343_v51, %v342_v50  ;;  %v1154_v55 = vpack.c.bf16 %v345_v54, %v344_v52  ;;  %v346_v56 = vld [vmem:[#allocation8 + $0x20] sm:$0xff]  ;;  %v347_v57 = vld [vmem:[#allocation8 + $0x28] sm:$0xff]  ;;  %v348_v59 = vld [vmem:[#allocation8 + $0x30] sm:$0xff] }
  0x8a   :  { %v1158_v58 = vpack.c.bf16 %v347_v57, %v346_v56  ;;  %v349_v60 = vld [vmem:[#allocation8 + $0x38] sm:$0xff]  ;;  %v762_v62 = vld [vmem:[%s1735_s2] ss:$0 sm:$0xff]  ;;  %v350_v5 = vld [vmem:[#allocation8 + $0x40] sm:$0xff] }
  0x8b   :  { %1129 = vmatpush3.bf16.msra.mxu1 %v1126_v23  ;;  %v1162_v61 = vpack.c.bf16 %v349_v60, %v348_v59  ;;  %v351_v6 = vld [vmem:[#allocation8 + $0x48] sm:$0xff]  ;;  %v352_v8 = vld [vmem:[#allocation8 + $0x50] sm:$0xff]  ;;  %v353_v9 = vld [vmem:[#allocation8 + $0x58] sm:$0xff] }
  0x8c   :  { %1101 = vmatpush3.bf16.msra.mxu0 %v1098_v20  ;;  %1131 = vmatprep.subr.bf16.mxu1 %v1130_v29  ;;  %v1166_v7 = vpack.c.bf16 %v351_v6, %v350_v5  ;;  %v1170_v10 = vpack.c.bf16 %v353_v9, %v352_v8  ;;  %v354_v11 = vld [vmem:[#allocation8 + $0x60] sm:$0xff]  ;;  %v355_v12 = vld [vmem:[#allocation8 + $0x68] sm:$0xff]  ;;  %v356_v13 = vld [vmem:[#allocation8 + $0x70] sm:$0xff] }
  0x8d   :  { %1103 = vmatprep.subr.bf16.mxu0 %v1102_v26  ;;  %v1174_v14 = vpack.c.bf16 %v355_v12, %v354_v11  ;;  %v357_v15 = vld [vmem:[#allocation8 + $0x78] sm:$0xff]  ;;  %v442_v17 = vld [vmem:[#allocation10] sm:$0xff]  ;;  %v443_v18 = vld [vmem:[#allocation10 + $0x8] sm:$0xff] }
  0x8e   :  { %v1178_v16 = vpack.c.bf16 %v357_v15, %v356_v13  ;;  %v444_v19 = vld [vmem:[#allocation10 + $0x10] sm:$0xff]  ;;  %v1182_v20 = vpack.c.bf16 %v443_v18, %v442_v17  ;;  %v445_v21 = vld [vmem:[#allocation10 + $0x18] sm:$0xff]  ;;  %v446_v23 = vld [vmem:[#allocation10 + $0x20] sm:$0xff] }
  0x8f   :  { %1133 = vmatpush3.bf16.msra.mxu1 %v1130_v29  ;;  %v1186_v22 = vpack.c.bf16 %v445_v21, %v444_v19  ;;  %v447_v24 = vld [vmem:[#allocation10 + $0x28] sm:$0xff]  ;;  %v449_v27 = vld [vmem:[#allocation10 + $0x38] sm:$0xff]  ;;  %v763_v29 = vld [vmem:[%s1737_s4] ss:$0 sm:$0xff] }
  0x90   :  { %1105 = vmatpush3.bf16.msra.mxu0 %v1102_v26  ;;  %1135 = vmatprep.subr.bf16.mxu1 %v1134_v40  ;;  %v1190_v25 = vpack.c.bf16 %v447_v24, %v446_v23  ;;  %v448_v26 = vld [vmem:[#allocation10 + $0x30] sm:$0xff]  ;;  %v454_v42 = vld [vmem:[#allocation10 + $0x60] sm:$0xff]  ;;  %v457_v46 = vld [vmem:[#allocation10 + $0x78] sm:$0xff] }
  0x91   :  { %1107 = vmatprep.subr.bf16.mxu0 %v1106_v30  ;;  %v1194_v28 = vpack.c.bf16 %v449_v27, %v448_v26  ;;  %v452_v39 = vld [vmem:[#allocation10 + $0x50] sm:$0xff]  ;;  %v542_v48 = vld [vmem:[#allocation11] sm:$0xff]  ;;  %v545_v52 = vld [vmem:[#allocation11 + $0x18] sm:$0xff] }
  0x92   :  { %v456_v44 = vld [vmem:[#allocation10 + $0x70] sm:$0xff]  ;;  %v546_v54 = vld [vmem:[#allocation11 + $0x20] sm:$0xff]  ;;  %v557_v13 = vld [vmem:[#allocation11 + $0x78] sm:$0xff] }
  0x93   :  { %1137 = vmatpush3.bf16.msra.mxu1 %v1134_v40  ;;  %v453_v40 = vld [vmem:[#allocation10 + $0x58] sm:$0xff]  ;;  %v544_v50 = vld [vmem:[#allocation11 + $0x10] sm:$0xff]  ;;  %v554_v9 = vld [vmem:[#allocation11 + $0x60] sm:$0xff] }
  0x94   :  { %1109 = vmatpush3.bf16.msra.mxu0 %v1106_v30  ;;  %1139 = vmatprep.subr.bf16.mxu1 %v1138_v43  ;;  %v1202_v41 = vpack.c.bf16 %v453_v40, %v452_v39  ;;  %v548_v57 = vld [vmem:[#allocation11 + $0x30] sm:$0xff]  ;;  %v642_v15 = vld [vmem:[#allocation13] sm:$0xff]  ;;  %v645_v19 = vld [vmem:[#allocation13 + $0x18] sm:$0xff] }
  0x95   :  { %1111 = vmatprep.subr.bf16.mxu0 %v1110_v33  ;;  %v764_v60 = vld [vmem:[%s1739_s6] ss:$0 sm:$0xff]  ;;  %v646_v21 = vld [vmem:[#allocation13 + $0x20] sm:$0xff] }
  0x96   :  { %v552_v6 = vld [vmem:[#allocation11 + $0x50] sm:$0xff]  ;;  %v654_v40 = vld [vmem:[#allocation13 + $0x60] sm:$0xff] }
  0x97   :  { %1141 = vmatpush3.bf16.msra.mxu1 %v1138_v43  ;;  %v455_v43 = vld [vmem:[#allocation10 + $0x68] sm:$0xff]  ;;  %v556_v11 = vld [vmem:[#allocation11 + $0x70] sm:$0xff] }
  0x98   :  { %1113 = vmatpush3.bf16.msra.mxu0 %v1110_v33  ;;  %1143 = vmatprep.subr.bf16.mxu1 %v1142_v47  ;;  %v1206_v45 = vpack.c.bf16 %v455_v43, %v454_v42  ;;  %v644_v17 = vld [vmem:[#allocation13 + $0x10] sm:$0xff] }
  0x99   :  { %1115 = vmatprep.subr.bf16.mxu0 %v1114_v36  ;;  %v648_v24 = vld [vmem:[#allocation13 + $0x30] sm:$0xff] }
  0x9a   :  { %v765_v27 = vld [vmem:[%s1741_s8] ss:$0 sm:$0xff] }
  0x9b   :  { %1145 = vmatpush3.bf16.msra.mxu1 %v1142_v47  ;;  %v1210_v47 = vpack.c.bf16 %v457_v46, %v456_v44  ;;  %v656_v42 = vld [vmem:[#allocation13 + $0x70] sm:$0xff]  ;;  %v657_v44 = vld [vmem:[#allocation13 + $0x78] sm:$0xff] }
  0x9c   :  { %1117 = vmatpush3.bf16.msra.mxu0 %v1114_v36  ;;  %1147 = vmatprep.subr.bf16.mxu1 %v1146_v49  ;;  %v450_v36 = vld [vmem:[#allocation10 + $0x40] sm:$0xff]  ;;  %v766_v46 = vld [vmem:[%s1743_s10] ss:$0 sm:$0xff]  ;;  %s1462_s10 = scalar_lea.vmem %s748_s29, 256 }
  0x9d   :  { %1151 = vmatprep.subr.bf16.mxu0 %v1150_v53  ;;  %p1463_p0 = scmp.ne.s32.totalorder %s748_s29, %s1462_s10  ;;  %p1468_p2 = scmp.lt.s32.totalorder %s1462_s10, %s1462_s10 }
  0x9f   :  { %909 = vmatmul.mubr.f32.vlgmr.msra.gmra.mrb[0].mxu0 %v141_v37  ;;  %1149 = vmatpush3.bf16.msra.mxu1 %v1146_v49  ;;  %v451_v37 = vld [vmem:[#allocation10 + $0x48] sm:$0xff]  ;;  %p1469_p3 = por %p1468_p2, %p1467_p1 }
  0xa0   :  { %1153 = vmatpush3.bf16.msra.mxu0 %v1150_v53  ;;  %1183 = vmatprep.subr.bf16.mxu1 %v1182_v20  ;;  %v1198_v38 = vpack.c.bf16 %v451_v37, %v450_v36  ;;  %v543_v49 = vld [vmem:[#allocation11 + $0x8] sm:$0xff]  ;;  %v1218_v53 = vpack.c.bf16 %v545_v52, %v544_v50  ;;  %v652_v37 = vld [vmem:[#allocation13 + $0x50] sm:$0xff] }
  0xa1   :  { %1155 = vmatprep.subr.bf16.mxu0 %v1154_v55  ;;  %v1214_v51 = vpack.c.bf16 %v543_v49, %v542_v48  ;;  %p1470_p4 = pnand %p1469_p3, %p1463_p0 }
  0xa4   :  { %1157 = vmatpush3.bf16.msra.mxu0 %v1154_v55  ;;  %v547_v55 = vld [vmem:[#allocation11 + $0x28] sm:$0xff] }
  0xa5   :  { %1159 = vmatprep.subr.bf16.mxu0 %v1158_v58  ;;  %v1222_v56 = vpack.c.bf16 %v547_v55, %v546_v54 }
  0xa8   :  { %1161 = vmatpush3.bf16.msra.mxu0 %v1158_v58  ;;  %v549_v58 = vld [vmem:[#allocation11 + $0x38] sm:$0xff] }
  0xa9   :  { %1163 = vmatprep.subr.bf16.mxu0 %v1162_v61  ;;  %v1226_v59 = vpack.c.bf16 %v549_v58, %v548_v57 }
  0xac   :  { %1165 = vmatpush3.bf16.msra.mxu0 %v1162_v61 }
  0xad   :  { %1167 = vmatprep.subr.bf16.mxu0 %v1166_v7 }
  0xb0   :  { %1169 = vmatpush3.bf16.msra.mxu0 %v1166_v7  ;;  %v553_v7 = vld [vmem:[#allocation11 + $0x58] sm:$0xff] }
  0xb1   :  { %1171 = vmatprep.subr.bf16.mxu0 %v1170_v10  ;;  %v1234_v8 = vpack.c.bf16 %v553_v7, %v552_v6 }
  0xb4   :  { %1173 = vmatpush3.bf16.msra.mxu0 %v1170_v10  ;;  %v555_v10 = vld [vmem:[#allocation11 + $0x68] sm:$0xff] }
  0xb5   :  { %1175 = vmatprep.subr.bf16.mxu0 %v1174_v14  ;;  %v1238_v12 = vpack.c.bf16 %v555_v10, %v554_v9 }
  0xb8   :  { %1177 = vmatpush3.bf16.msra.mxu0 %v1174_v14  ;;  %v1242_v14 = vpack.c.bf16 %v557_v13, %v556_v11 }
  0xb9   :  { %1179 = vmatprep.subr.bf16.mxu0 %v1178_v16 }
  0xbc   :  { %1181 = vmatpush3.bf16.msra.mxu0 %v1178_v16  ;;  %v643_v16 = vld [vmem:[#allocation13 + $0x8] sm:$0xff] }
  0xbd   :  { %1215 = vmatprep.subr.bf16.mxu0 %v1214_v51  ;;  %v1246_v18 = vpack.c.bf16 %v643_v16, %v642_v15 }
 0x172   :  { %v910_v63 = vpop.f32.mrb[0].mxu0 }
 0x173   :  { %v237_v0 = vadd.f32 %v910_v63, %v762_v62  ;;  %v231_v1 = vpop.f32.mrb[1].mxu0 }
 0x174   :  { %v232_v2 = vadd.f32 %v762_v62, %v231_v1 }
 0x176   :  { %1288 = vtanh.f32 %v232_v2 }
 0x177   :  { %1290 = vtanh.f32 %v237_v0 }
 0x180   :  { %v1289_v3 = vpop.eup %1288 }
 0x181   :  { %v1291_v4 = vpop.eup %1290  ;;  %943 = vmatprep.mubr.f32.mxu1 %v1289_v3  ;;  %v550_v3 = vld [vmem:[#allocation11 + $0x40] sm:$0xff] }
 0x182   :  { %944 = vmatmul.mubr.f32.vlgmr.msra.gmra.mrb[0].mxu1 %v1291_v4  ;;  %v551_v4 = vld [vmem:[#allocation11 + $0x48] sm:$0xff] }
 0x183   :  { %1185 = vmatpush3.bf16.msra.mxu1 %v1182_v20  ;;  %v1230_v5 = vpack.c.bf16 %v551_v4, %v550_v3  ;;  %v1250_v20 = vpack.c.bf16 %v645_v19, %v644_v17 }
 0x184   :  { %1187 = vmatprep.subr.bf16.mxu1 %v1186_v22 }
 0x187   :  { %1189 = vmatpush3.bf16.msra.mxu1 %v1186_v22  ;;  %v647_v22 = vld [vmem:[#allocation13 + $0x28] sm:$0xff] }
 0x188   :  { %1191 = vmatprep.subr.bf16.mxu1 %v1190_v25  ;;  %v1254_v23 = vpack.c.bf16 %v647_v22, %v646_v21 }
 0x18b   :  { %1193 = vmatpush3.bf16.msra.mxu1 %v1190_v25  ;;  %v649_v25 = vld [vmem:[#allocation13 + $0x38] sm:$0xff] }
 0x18c   :  { %1195 = vmatprep.subr.bf16.mxu1 %v1194_v28  ;;  %v1258_v26 = vpack.c.bf16 %v649_v25, %v648_v24 }
 0x18f   :  { %1197 = vmatpush3.bf16.msra.mxu1 %v1194_v28 }
 0x190   :  { %1199 = vmatprep.subr.bf16.mxu1 %v1198_v38 }
 0x193   :  { %1201 = vmatpush3.bf16.msra.mxu1 %v1198_v38  ;;  %v653_v38 = vld [vmem:[#allocation13 + $0x58] sm:$0xff] }
 0x194   :  { %1203 = vmatprep.subr.bf16.mxu1 %v1202_v41  ;;  %v1266_v39 = vpack.c.bf16 %v653_v38, %v652_v37 }
 0x197   :  { %1205 = vmatpush3.bf16.msra.mxu1 %v1202_v41  ;;  %v655_v41 = vld [vmem:[#allocation13 + $0x68] sm:$0xff] }
 0x198   :  { %1207 = vmatprep.subr.bf16.mxu1 %v1206_v45  ;;  %v1270_v43 = vpack.c.bf16 %v655_v41, %v654_v40 }
 0x19b   :  { %1209 = vmatpush3.bf16.msra.mxu1 %v1206_v45  ;;  %v1274_v45 = vpack.c.bf16 %v657_v44, %v656_v42 }
 0x19c   :  { %1211 = vmatprep.subr.bf16.mxu1 %v1210_v47 }
 0x19f   :  { %1213 = vmatpush3.bf16.msra.mxu1 %v1210_v47 }
 0x1a0   :  { %1247 = vmatprep.subr.bf16.mxu1 %v1246_v18 }
 0x255   :  { %v945_v30 = vpop.f32.mrb[0].mxu1 }
 0x256   :  { %v337_v31 = vadd.f32 %v945_v30, %v763_v29  ;;  %v331_v32 = vpop.f32.mrb[1].mxu1 }
 0x257   :  { %v332_v33 = vadd.f32 %v763_v29, %v331_v32 }
 0x259   :  { %1292 = vtanh.f32 %v332_v33 }
 0x25a   :  { %1294 = vtanh.f32 %v337_v31 }
 0x263   :  { %v1293_v34 = vpop.eup %1292 }
 0x264   :  { %v1295_v35 = vpop.eup %1294  ;;  %978 = vmatprep.mubr.f32.mxu0 %v1293_v34  ;;  %v650_v34 = vld [vmem:[#allocation13 + $0x40] sm:$0xff] }
 0x265   :  { %979 = vmatmul.mubr.f32.vlgmr.msra.gmra.mrb[2].mxu0 %v1295_v35  ;;  %v651_v35 = vld [vmem:[#allocation13 + $0x48] sm:$0xff] }
 0x266   :  { %1217 = vmatpush3.bf16.msra.mxu0 %v1214_v51  ;;  %v1262_v36 = vpack.c.bf16 %v651_v35, %v650_v34 }
 0x267   :  { %1219 = vmatprep.subr.bf16.mxu0 %v1218_v53 }
 0x26a   :  { %1221 = vmatpush3.bf16.msra.mxu0 %v1218_v53  ;;  %v767_v53 = vld [vmem:[%s1745_s12] ss:$0 sm:$0xff] }
 0x26b   :  { %1223 = vmatprep.subr.bf16.mxu0 %v1222_v56 }
 0x26e   :  { %1225 = vmatpush3.bf16.msra.mxu0 %v1222_v56 }
 0x26f   :  { %1227 = vmatprep.subr.bf16.mxu0 %v1226_v59 }
 0x272   :  { %1229 = vmatpush3.bf16.msra.mxu0 %v1226_v59 }
 0x273   :  { %1231 = vmatprep.subr.bf16.mxu0 %v1230_v5 }
 0x276   :  { %1233 = vmatpush3.bf16.msra.mxu0 %v1230_v5 }
 0x277   :  { %1235 = vmatprep.subr.bf16.mxu0 %v1234_v8 }
 0x27a   :  { %1237 = vmatpush3.bf16.msra.mxu0 %v1234_v8 }
 0x27b   :  { %1239 = vmatprep.subr.bf16.mxu0 %v1238_v12 }
 0x27e   :  { %1241 = vmatpush3.bf16.msra.mxu0 %v1238_v12 }
 0x27f   :  { %1243 = vmatprep.subr.bf16.mxu0 %v1242_v14 }
 0x282   :  { %1245 = vmatpush3.bf16.msra.mxu0 %v1242_v14 }
 0x338   :  { %v980_v61 = vpop.f32.mrb[2].mxu0 }
 0x339   :  { %v437_v62 = vadd.f32 %v980_v61, %v764_v60  ;;  %v431_v63 = vpop.f32.mrb[3].mxu0 }
 0x33a   :  { %v432_v0 = vadd.f32 %v764_v60, %v431_v63 }
 0x33c   :  { %1296 = vtanh.f32 %v432_v0 }
 0x33d   :  { %1298 = vtanh.f32 %v437_v62 }
 0x346   :  { %v1297_v1 = vpop.eup %1296 }
 0x347   :  { %v1299_v2 = vpop.eup %1298  ;;  %1013 = vmatprep.mubr.f32.mxu1 %v1297_v1 }
 0x348   :  { %1014 = vmatmul.mubr.f32.vlgmr.msra.gmra.mrb[2].mxu1 %v1299_v2 }
 0x349   :  { %1249 = vmatpush3.bf16.msra.mxu1 %v1246_v18 }
 0x34a   :  { %1251 = vmatprep.subr.bf16.mxu1 %v1250_v20 }
 0x34d   :  { %1253 = vmatpush3.bf16.msra.mxu1 %v1250_v20 }
 0x34e   :  { %1255 = vmatprep.subr.bf16.mxu1 %v1254_v23 }
 0x351   :  { %1257 = vmatpush3.bf16.msra.mxu1 %v1254_v23 }
 0x352   :  { %1259 = vmatprep.subr.bf16.mxu1 %v1258_v26 }
 0x355   :  { %1261 = vmatpush3.bf16.msra.mxu1 %v1258_v26 }
 0x356   :  { %1263 = vmatprep.subr.bf16.mxu1 %v1262_v36 }
 0x359   :  { %1265 = vmatpush3.bf16.msra.mxu1 %v1262_v36 }
 0x35a   :  { %1267 = vmatprep.subr.bf16.mxu1 %v1266_v39 }
 0x35d   :  { %1269 = vmatpush3.bf16.msra.mxu1 %v1266_v39 }
 0x35e   :  { %1271 = vmatprep.subr.bf16.mxu1 %v1270_v43 }
 0x361   :  { %1273 = vmatpush3.bf16.msra.mxu1 %v1270_v43 }
 0x362   :  { %1275 = vmatprep.subr.bf16.mxu1 %v1274_v45 }
 0x365   :  { %1277 = vmatpush3.bf16.msra.mxu1 %v1274_v45 }
 0x41b   :  { %v1015_v28 = vpop.f32.mrb[2].mxu1 }
 0x41c   :  { %v537_v29 = vadd.f32 %v1015_v28, %v765_v27  ;;  %v531_v30 = vpop.f32.mrb[3].mxu1 }
 0x41d   :  { %v532_v31 = vadd.f32 %v765_v27, %v531_v30 }
 0x41f   :  { %1300 = vtanh.f32 %v532_v31 }
 0x420   :  { %1302 = vtanh.f32 %v537_v29 }
 0x429   :  { %v1301_v32 = vpop.eup %1300 }
 0x42a   :  { %v1303_v33 = vpop.eup %1302  ;;  %1048 = vmatprep.mubr.f32.mxu0 %v1301_v32 }
 0x42b   :  { %1049 = vmatmul.mubr.f32.vlgmr.msra.gmra.mrb[4].mxu0 %v1303_v33 }
 0x4fe   :  { %v1050_v47 = vpop.f32.mrb[4].mxu0 }
 0x4ff   :  { %v637_v48 = vadd.f32 %v1050_v47, %v766_v46  ;;  %v631_v49 = vpop.f32.mrb[5].mxu0 }
 0x500   :  { %v632_v50 = vadd.f32 %v766_v46, %v631_v49 }
 0x502   :  { %1304 = vtanh.f32 %v632_v50 }
 0x503   :  { %1306 = vtanh.f32 %v637_v48 }
 0x50c   :  { %v1305_v51 = vpop.eup %1304 }
 0x50d   :  { %v1307_v52 = vpop.eup %1306  ;;  %1083 = vmatprep.mubr.f32.mxu1 %v1305_v51 }
 0x50e   :  { %1084 = vmatmul.mubr.f32.vlgmr.msra.gmra.mrb[4].mxu1 %v1307_v52 }
 0x5e1   :  { %v1085_v54 = vpop.f32.mrb[4].mxu1 }
 0x5e2   :  { %v737_v55 = vadd.f32 %v1085_v54, %v767_v53  ;;  %v731_v56 = vpop.f32.mrb[5].mxu1 }
 0x5e3   :  { %v732_v57 = vadd.f32 %v767_v53, %v731_v56 }
 0x5e4   :  { %741 = vst [vmem:[#allocation14 + $0x8] sm:$0xff] %v737_v55 }
 0x5e5   :  { %740 = vst [vmem:[#allocation14] sm:$0xff] %v732_v57 }
 0x5e6   :  { %1473 = shalt.err (!%p1470_p4)
}
 0x5e7   :  { %s1474_s12 = scalar_lea.hbm %s1746_s13, 256 }
 0x5e8   :  { %p1475_p5 = scmp.ne.s32.totalorder %s1746_s13, %s1474_s12  ;;  %p1478_p6 = scmp.lt.u32.totalorder %s1474_s12, %s1746_s13 }
 0x5ea   :  { %p1480_p7 = pnand %p1478_p6, %p1475_p5 }
 0x5ec   :  { %1483 = shalt.err (!%p1480_p7)
}
 0x5ed   :  { %753 = dma.vmem_to_hbm [thread:$0]  %s748_s29, 256, %s1746_s13, [#allocation4], %s1496_s20, %s1496_s20, %s1497_s21  }
 0x5ee   :  { %1492 = dma.done.wait [#allocation4], 256  }
 0x5ef   :  { %1493 = vsyncadd [#allocation4], 4294967040 }
 0x5f0   :  { %757 = vsyncpa [#allocation3], 1 }
 0x5f1   :  { %758 = vsyncpa [#allocation6], 1 }
 0x5f2   :  { %759 = vsyncpa [#allocation9], 1 }
 0x5f3   :  { %760 = vsyncpa [#allocation12], 1 }
 0x5f4   :  { %761 = vsyncpa [#allocation4], 1 }

// kernel: tpu_custom_call.1
= control target key start
LH: loop header
LB: loop body
LE: loop exit
PB: predicated region body
PF: predicated region fallthrough
CT: control target
= control target key end

     0   :  { %18 = vsyncpa [#allocation3], 0  ;;  %s1733_s0 = inlined_call_operand.hbm [shape: f32[16,128], index: 0, kind: input, shape index: {}]   ;;  %s1734_s1 = inlined_call_operand.hbm [shape: f32[128,128], index: 1, kind: input, shape index: {}]   ;;  %s1735_s2 = inlined_call_operand.vmem [shape: f32[1,128], index: 2, kind: input, shape index: {}]   ;;  %s1736_s3 = inlined_call_operand.hbm [shape: f32[128,128], index: 3, kind: input, shape index: {}]   ;;  %s1737_s4 = inlined_call_operand.vmem [shape: f32[1,128], index: 4, kind: input, shape index: {}]   ;;  %s1738_s5 = inlined_call_operand.hbm [shape: f32[128,128], index: 5, kind: input, shape index: {}]   ;;  %s1739_s6 = inlined_call_operand.vmem [shape: f32[1,128], index: 6, kind: input, shape index: {}]   ;;  %s1740_s7 = inlined_call_operand.hbm [shape: f32[128,128], index: 7, kind: input, shape index: {}]   ;;  %s1741_s8 = inlined_call_operand.vmem [shape: f32[1,128], index: 8, kind: input, shape index: {}]   ;;  %s1742_s9 = inlined_call_operand.hbm [shape: f32[128,128], index: 9, kind: input, shape index: {}]   ;;  %s1743_s10 = inlined_call_operand.vmem [shape: f32[1,128], index: 10, kind: input, shape index: {}]   ;;  %s1744_s11 = inlined_call_operand.hbm [shape: f32[128,128], index: 11, kind: input, shape index: {}]   ;;  %s1745_s12 = inlined_call_operand.vmem [shape: f32[1,128], index: 12, kind: input, shape index: {}]   ;;  %s1746_s13 = inlined_call_operand.hbm [shape: f32[16,128], index: 13, kind: output, shape index: {}]  }
   0x1   :  { %19 = vsyncpa [#allocation6], 0 }
   0x2   :  { %20 = vsyncpa [#allocation9], 0 }
   0x3   :  { %21 = vsyncpa [#allocation12], 0 }
   0x4   :  { %22 = vsyncpa [#allocation4], 0  ;;  %s1494_s25 = smov [#allocation5]   ;;  %s1495_s27 = smov [#allocation8]  }
   0x5   :  { %s40_s26 = sshll.u32 %s1494_s25, 4  ;;  %s68_s28 = sshll.u32 %s1495_s27, 4  ;;  %s41_s26 = int_to_ptr.vmem [resolvable:$true] %s40_s26  ;;  %s1574_s28 = int_to_ptr.vmem [resolvable:$true] %s68_s28 }
   0x6   :  { %s1308_s14 = scalar_lea.hbm %s1734_s1, 2048 }
   0x7   :  { %p1309_p0 = scmp.ne.s32.totalorder %s1734_s1, %s1308_s14  ;;  %p1312_p1 = scmp.lt.u32.totalorder %s1308_s14, %s1734_s1 }
   0x9   :  { %p1314_p2 = pnand %p1312_p1, %p1309_p0 }
   0xb   :  { %1317 = shalt.err (!%p1314_p2)
}
   0xc   :  { %s1318_s19 = scalar_lea.vmem %s41_s26, 2048  ;;  %p1323_p4 = scmp.lt.s32.totalorder %s41_s26, %s41_s26 }
   0xd   :  { %p1319_p3 = scmp.ne.s32.totalorder %s41_s26, %s1318_s19  ;;  %p1324_p5 = scmp.lt.s32.totalorder %s1318_s19, %s1318_s19 }
   0xf   :  { %p1325_p6 = por %p1324_p5, %p1323_p4 }
  0x11   :  { %p1326_p7 = pnand %p1325_p6, %p1319_p3 }
  0x13   :  { %1329 = shalt.err (!%p1326_p7)
}
  0x14   :  { %s1496_s20 = smov 128   ;;  %s1497_s21 = smov 8  }
  0x15   :  { %46 = dma.hbm_to_vmem [thread:$0]  %s1734_s1, 2048, %s41_s26, [#allocation6], %s1496_s20, %s1496_s20, %s1497_s21  }
  0x16   :  { %s1330_s27 = scalar_lea.hbm %s1738_s5, 2048 }
  0x17   :  { %p1331_p8 = scmp.ne.s32.totalorder %s1738_s5, %s1330_s27  ;;  %p1334_p9 = scmp.lt.u32.totalorder %s1330_s27, %s1738_s5 }
  0x19   :  { %p1336_p10 = pnand %p1334_p9, %p1331_p8 }
  0x1b   :  { %1339 = shalt.err (!%p1336_p10)
}
  0x1c   :  { %s1340_s16 = scalar_lea.vmem %s1574_s28, 2048  ;;  %p1345_p12 = scmp.lt.s32.totalorder %s1574_s28, %s1574_s28 }
  0x1d   :  { %p1341_p11 = scmp.ne.s32.totalorder %s1574_s28, %s1340_s16  ;;  %p1346_p13 = scmp.lt.s32.totalorder %s1340_s16, %s1340_s16 }
  0x1f   :  { %p1347_p0 = por %p1346_p13, %p1345_p12 }
  0x21   :  { %p1348_p1 = pnand %p1347_p0, %p1341_p11 }
  0x23   :  { %1351 = shalt.err (!%p1348_p1)
}
  0x24   :  { %74 = dma.hbm_to_vmem [thread:$0]  %s1738_s5, 2048, %s1574_s28, [#allocation9], %s1496_s20, %s1496_s20, %s1497_s21  }
  0x25   :  { %s1498_s17 = smov [#allocation11]   ;;  %s1499_s19 = smov [#allocation2]  }
  0x26   :  { %s96_s18 = sshll.u32 %s1498_s17, 4  ;;  %s28_s22 = sshll.u32 %s1499_s19, 4  ;;  %s97_s18 = int_to_ptr.vmem [resolvable:$true] %s96_s18  ;;  %s1611_s22 = int_to_ptr.vmem [resolvable:$true] %s28_s22 }
  0x27   :  { %s1352_s25 = scalar_lea.hbm %s1742_s9, 2048 }
  0x28   :  { %p1353_p2 = scmp.ne.s32.totalorder %s1742_s9, %s1352_s25  ;;  %p1356_p3 = scmp.lt.u32.totalorder %s1352_s25, %s1742_s9 }
  0x2a   :  { %p1358_p4 = pnand %p1356_p3, %p1353_p2 }
  0x2c   :  { %1361 = shalt.err (!%p1358_p4)
}
  0x2d   :  { %s1362_s5 = scalar_lea.vmem %s97_s18, 2048  ;;  %p1367_p6 = scmp.lt.s32.totalorder %s97_s18, %s97_s18 }
  0x2e   :  { %p1363_p5 = scmp.ne.s32.totalorder %s97_s18, %s1362_s5  ;;  %p1368_p7 = scmp.lt.s32.totalorder %s1362_s5, %s1362_s5 }
  0x30   :  { %p1369_p8 = por %p1368_p7, %p1367_p6 }
  0x32   :  { %p1370_p9 = pnand %p1369_p8, %p1363_p5 }
  0x34   :  { %1373 = shalt.err (!%p1370_p9)
}
  0x35   :  { %102 = dma.hbm_to_vmem [thread:$0]  %s1742_s9, 2048, %s97_s18, [#allocation12], %s1496_s20, %s1496_s20, %s1497_s21  }
  0x36   :  { %s1374_s26 = scalar_lea.hbm %s1733_s0, 256 }
  0x37   :  { %p1375_p10 = scmp.ne.s32.totalorder %s1733_s0, %s1374_s26  ;;  %p1378_p11 = scmp.lt.u32.totalorder %s1374_s26, %s1733_s0 }
  0x39   :  { %p1380_p12 = pnand %p1378_p11, %p1375_p10 }
  0x3b   :  { %1383 = shalt.err (!%p1380_p12)
}
  0x3c   :  { %s1384_s25 = scalar_lea.vmem %s1611_s22, 256  ;;  %p1389_p0 = scmp.lt.s32.totalorder %s1611_s22, %s1611_s22 }
  0x3d   :  { %p1385_p13 = scmp.ne.s32.totalorder %s1611_s22, %s1384_s25  ;;  %p1390_p1 = scmp.lt.s32.totalorder %s1384_s25, %s1384_s25 }
  0x3f   :  { %p1391_p2 = por %p1390_p1, %p1389_p0 }
  0x41   :  { %p1392_p3 = pnand %p1391_p2, %p1385_p13 }
  0x43   :  { %1395 = shalt.err (!%p1392_p3)
}
  0x44   :  { %34 = dma.hbm_to_vmem [thread:$0]  %s1733_s0, 256, %s1611_s22, [#allocation3], %s1496_s20, %s1496_s20, %s1497_s21  }
  0x45   :  { %s1500_s27 = smov [#allocation7]   ;;  %s1501_s30 = smov [#allocation10]  }
  0x46   :  { %s54_s29 = sshll.u32 %s1500_s27, 4  ;;  %s82_s14 = sshll.u32 %s1501_s30, 4  ;;  %s55_s29 = int_to_ptr.vmem [resolvable:$true] %s54_s29  ;;  %s1648_s14 = int_to_ptr.vmem [resolvable:$true] %s82_s14 }
  0x47   :  { %s1396_s15 = scalar_lea.hbm %s1736_s3, 2048 }
  0x48   :  { %p1397_p4 = scmp.ne.s32.totalorder %s1736_s3, %s1396_s15  ;;  %p1400_p5 = scmp.lt.u32.totalorder %s1396_s15, %s1736_s3 }
  0x4a   :  { %p1402_p6 = pnand %p1400_p5, %p1397_p4 }
  0x4c   :  { %1405 = shalt.err (!%p1402_p6)
}
  0x4d   :  { %s1406_s0 = scalar_lea.vmem %s55_s29, 2048  ;;  %p1411_p8 = scmp.lt.s32.totalorder %s55_s29, %s55_s29 }
  0x4e   :  { %p1407_p7 = scmp.ne.s32.totalorder %s55_s29, %s1406_s0  ;;  %p1412_p9 = scmp.lt.s32.totalorder %s1406_s0, %s1406_s0 }
  0x50   :  { %p1413_p10 = por %p1412_p9, %p1411_p8 }
  0x52   :  { %p1414_p11 = pnand %p1413_p10, %p1407_p7 }
  0x54   :  { %1417 = shalt.err (!%p1414_p11)
}
  0x55   :  { %60 = dma.hbm_to_vmem [thread:$0]  %s1736_s3, 2048, %s55_s29, [#allocation6], %s1496_s20, %s1496_s20, %s1497_s21  }
  0x56   :  { %s1418_s25 = scalar_lea.hbm %s1740_s7, 2048 }
  0x57   :  { %p1419_p12 = scmp.ne.s32.totalorder %s1740_s7, %s1418_s25  ;;  %p1422_p13 = scmp.lt.u32.totalorder %s1418_s25, %s1740_s7 }
  0x59   :  { %p1424_p0 = pnand %p1422_p13, %p1419_p12 }
  0x5b   :  { %1427 = shalt.err (!%p1424_p0)
}
  0x5c   :  { %s1428_s5 = scalar_lea.vmem %s1648_s14, 2048  ;;  %p1433_p2 = scmp.lt.s32.totalorder %s1648_s14, %s1648_s14 }
  0x5d   :  { %p1429_p1 = scmp.ne.s32.totalorder %s1648_s14, %s1428_s5  ;;  %p1434_p3 = scmp.lt.s32.totalorder %s1428_s5, %s1428_s5 }
  0x5f   :  { %p1435_p4 = por %p1434_p3, %p1433_p2 }
  0x61   :  { %p1436_p5 = pnand %p1435_p4, %p1429_p1 }
  0x63   :  { %1439 = shalt.err (!%p1436_p5)
}
  0x64   :  { %88 = dma.hbm_to_vmem [thread:$0]  %s1740_s7, 2048, %s1648_s14, [#allocation9], %s1496_s20, %s1496_s20, %s1497_s21  }
  0x65   :  { %s1502_s28 = smov [#allocation13]   ;;  %s1440_s26 = scalar_lea.hbm %s1744_s11, 2048 }
  0x66   :  { %s110_s15 = sshll.u32 %s1502_s28, 4  ;;  %p1441_p6 = scmp.ne.s32.totalorder %s1744_s11, %s1440_s26  ;;  %s111_s15 = int_to_ptr.vmem [resolvable:$true] %s110_s15 }
  0x67   :  { %p1444_p7 = scmp.lt.u32.totalorder %s1440_s26, %s1744_s11 }
  0x69   :  { %p1446_p8 = pnand %p1444_p7, %p1441_p6 }
  0x6b   :  { %1449 = shalt.err (!%p1446_p8)
}
  0x6c   :  { %s1450_s23 = scalar_lea.vmem %s111_s15, 2048  ;;  %p1455_p10 = scmp.lt.s32.totalorder %s111_s15, %s111_s15 }
  0x6d   :  { %p1451_p9 = scmp.ne.s32.totalorder %s111_s15, %s1450_s23  ;;  %p1456_p11 = scmp.lt.s32.totalorder %s1450_s23, %s1450_s23 }
  0x6f   :  { %p1457_p12 = por %p1456_p11, %p1455_p10 }
  0x71   :  { %p1458_p13 = pnand %p1457_p12, %p1451_p9 }
  0x73   :  { %1461 = shalt.err (!%p1458_p13)
}
  0x74   :  { %116 = dma.hbm_to_vmem [thread:$0]  %s1744_s11, 2048, %s111_s15, [#allocation12], %s1496_s20, %s1496_s20, %s1497_s21  }
  0x75   :  { %1484 = dma.done.wait [#allocation3], 256  }
  0x76   :  { %1485 = vsyncadd [#allocation3], 4294967040 }
  0x77   :  { %1486 = dma.done.wait [#allocation6], 4096  }
  0x78   :  { %1487 = vsyncadd [#allocation6], 4294963200 }
  0x79   :  { %1488 = dma.done.wait [#allocation9], 4096  }
  0x7a   :  { %1489 = vsyncadd [#allocation9], 4294963200 }
  0x7b   :  { %1490 = dma.done.wait [#allocation12], 4096  }
  0x7c   :  { %1491 = vsyncadd [#allocation12], 4294963200  ;;  %v142_v0 = vld [vmem:[#allocation5] sm:$0xff]  ;;  %v143_v1 = vld [vmem:[#allocation5 + $0x8] sm:$0xff]  ;;  %s1503_s3 = smov [#allocation14]  }
  0x7d   :  { %v144_v2 = vld [vmem:[#allocation5 + $0x10] sm:$0xff]  ;;  %v1086_v3 = vpack.c.bf16 %v143_v1, %v142_v0  ;;  %v145_v4 = vld [vmem:[#allocation5 + $0x18] sm:$0xff]  ;;  %v146_v6 = vld [vmem:[#allocation5 + $0x20] sm:$0xff]  ;;  %s747_s29 = sshll.u32 %s1503_s3, 4  ;;  %s748_s29 = int_to_ptr.vmem [resolvable:$true] %s747_s29 }
  0x7e   :  { %v1090_v5 = vpack.c.bf16 %v145_v4, %v144_v2  ;;  %v147_v7 = vld [vmem:[#allocation5 + $0x28] sm:$0xff]  ;;  %v148_v9 = vld [vmem:[#allocation5 + $0x30] sm:$0xff]  ;;  %v149_v10 = vld [vmem:[#allocation5 + $0x38] sm:$0xff]  ;;  %p1467_p1 = scmp.lt.s32.totalorder %s748_s29, %s748_s29 }
  0x7f   :  { %1087 = vmatprep.subr.bf16.mxu0 %v1086_v3  ;;  %v1094_v8 = vpack.c.bf16 %v147_v7, %v146_v6  ;;  %v140_v11 = vld [vmem:[#allocation2] sm:$0xff]  ;;  %v242_v12 = vld [vmem:[#allocation7] sm:$0xff]  ;;  %v243_v13 = vld [vmem:[#allocation7 + $0x8] sm:$0xff]  ;;  %v1098_v20 = vpack.c.bf16 %v149_v10, %v148_v9 }
  0x80   :  { %1089 = vmatpush3.bf16.msra.mxu0 %v1086_v3  ;;  %908 = vmatprep.mubr.f32.mxu0 %v140_v11  ;;  %v244_v14 = vld [vmem:[#allocation7 + $0x10] sm:$0xff]  ;;  %v1118_v15 = vpack.c.bf16 %v243_v13, %v242_v12  ;;  %v245_v16 = vld [vmem:[#allocation7 + $0x18] sm:$0xff]  ;;  %v246_v18 = vld [vmem:[#allocation7 + $0x20] sm:$0xff] }
  0x81   :  { %1091 = vmatprep.subr.bf16.mxu0 %v1090_v5  ;;  %v1122_v17 = vpack.c.bf16 %v245_v16, %v244_v14  ;;  %v247_v19 = vld [vmem:[#allocation7 + $0x28] sm:$0xff]  ;;  %v150_v21 = vld [vmem:[#allocation5 + $0x40] sm:$0xff]  ;;  %v248_v24 = vld [vmem:[#allocation7 + $0x30] sm:$0xff] }
  0x82   :  { %1119 = vmatprep.subr.bf16.mxu1 %v1118_v15  ;;  %v151_v22 = vld [vmem:[#allocation5 + $0x48] sm:$0xff]  ;;  %v1126_v23 = vpack.c.bf16 %v247_v19, %v246_v18  ;;  %v249_v25 = vld [vmem:[#allocation7 + $0x38] sm:$0xff]  ;;  %v152_v27 = vld [vmem:[#allocation5 + $0x50] sm:$0xff] }
  0x83   :  { %1121 = vmatpush3.bf16.msra.mxu1 %v1118_v15  ;;  %v1102_v26 = vpack.c.bf16 %v151_v22, %v150_v21  ;;  %v153_v28 = vld [vmem:[#allocation5 + $0x58] sm:$0xff]  ;;  %v1130_v29 = vpack.c.bf16 %v249_v25, %v248_v24  ;;  %v154_v31 = vld [vmem:[#allocation5 + $0x60] sm:$0xff]  ;;  %v155_v32 = vld [vmem:[#allocation5 + $0x68] sm:$0xff] }
  0x84   :  { %1093 = vmatpush3.bf16.msra.mxu0 %v1090_v5  ;;  %1123 = vmatprep.subr.bf16.mxu1 %v1122_v17  ;;  %v1106_v30 = vpack.c.bf16 %v153_v28, %v152_v27  ;;  %v1110_v33 = vpack.c.bf16 %v155_v32, %v154_v31  ;;  %v156_v34 = vld [vmem:[#allocation5 + $0x70] sm:$0xff]  ;;  %v157_v35 = vld [vmem:[#allocation5 + $0x78] sm:$0xff]  ;;  %v250_v38 = vld [vmem:[#allocation7 + $0x40] sm:$0xff] }
  0x85   :  { %1095 = vmatprep.subr.bf16.mxu0 %v1094_v8  ;;  %v1114_v36 = vpack.c.bf16 %v157_v35, %v156_v34  ;;  %v141_v37 = vld [vmem:[#allocation2 + $0x8] sm:$0xff]  ;;  %v251_v39 = vld [vmem:[#allocation7 + $0x48] sm:$0xff]  ;;  %v252_v41 = vld [vmem:[#allocation7 + $0x50] sm:$0xff] }
  0x86   :  { %v1134_v40 = vpack.c.bf16 %v251_v39, %v250_v38  ;;  %v253_v42 = vld [vmem:[#allocation7 + $0x58] sm:$0xff]  ;;  %v254_v44 = vld [vmem:[#allocation7 + $0x60] sm:$0xff]  ;;  %v255_v45 = vld [vmem:[#allocation7 + $0x68] sm:$0xff] }
  0x87   :  { %1125 = vmatpush3.bf16.msra.mxu1 %v1122_v17  ;;  %v1138_v43 = vpack.c.bf16 %v253_v42, %v252_v41  ;;  %v256_v46 = vld [vmem:[#allocation7 + $0x70] sm:$0xff]  ;;  %v1142_v47 = vpack.c.bf16 %v255_v45, %v254_v44  ;;  %v257_v48 = vld [vmem:[#allocation7 + $0x78] sm:$0xff]  ;;  %v342_v50 = vld [vmem:[#allocation8] sm:$0xff] }
  0x88   :  { %1097 = vmatpush3.bf16.msra.mxu0 %v1094_v8  ;;  %1127 = vmatprep.subr.bf16.mxu1 %v1126_v23  ;;  %v1146_v49 = vpack.c.bf16 %v257_v48, %v256_v46  ;;  %v343_v51 = vld [vmem:[#allocation8 + $0x8] sm:$0xff]  ;;  %v344_v52 = vld [vmem:[#allocation8 + $0x10] sm:$0xff]  ;;  %v345_v54 = vld [vmem:[#allocation8 + $0x18] sm:$0xff] }
  0x89   :  { %1099 = vmatprep.subr.bf16.mxu0 %v1098_v20  ;;  %v1150_v53 = vpack.c.bf16 %v343_v51, %v342_v50  ;;  %v1154_v55 = vpack.c.bf16 %v345_v54, %v344_v52  ;;  %v346_v56 = vld [vmem:[#allocation8 + $0x20] sm:$0xff]  ;;  %v347_v57 = vld [vmem:[#allocation8 + $0x28] sm:$0xff]  ;;  %v348_v59 = vld [vmem:[#allocation8 + $0x30] sm:$0xff] }
  0x8a   :  { %v1158_v58 = vpack.c.bf16 %v347_v57, %v346_v56  ;;  %v349_v60 = vld [vmem:[#allocation8 + $0x38] sm:$0xff]  ;;  %v762_v62 = vld [vmem:[%s1735_s2] ss:$0 sm:$0xff]  ;;  %v350_v5 = vld [vmem:[#allocation8 + $0x40] sm:$0xff] }
  0x8b   :  { %1129 = vmatpush3.bf16.msra.mxu1 %v1126_v23  ;;  %v1162_v61 = vpack.c.bf16 %v349_v60, %v348_v59  ;;  %v351_v6 = vld [vmem:[#allocation8 + $0x48] sm:$0xff]  ;;  %v352_v8 = vld [vmem:[#allocation8 + $0x50] sm:$0xff]  ;;  %v353_v9 = vld [vmem:[#allocation8 + $0x58] sm:$0xff] }
  0x8c   :  { %1101 = vmatpush3.bf16.msra.mxu0 %v1098_v20  ;;  %1131 = vmatprep.subr.bf16.mxu1 %v1130_v29  ;;  %v1166_v7 = vpack.c.bf16 %v351_v6, %v350_v5  ;;  %v1170_v10 = vpack.c.bf16 %v353_v9, %v352_v8  ;;  %v354_v11 = vld [vmem:[#allocation8 + $0x60] sm:$0xff]  ;;  %v355_v12 = vld [vmem:[#allocation8 + $0x68] sm:$0xff]  ;;  %v356_v13 = vld [vmem:[#allocation8 + $0x70] sm:$0xff] }
  0x8d   :  { %1103 = vmatprep.subr.bf16.mxu0 %v1102_v26  ;;  %v1174_v14 = vpack.c.bf16 %v355_v12, %v354_v11  ;;  %v357_v15 = vld [vmem:[#allocation8 + $0x78] sm:$0xff]  ;;  %v442_v17 = vld [vmem:[#allocation10] sm:$0xff]  ;;  %v443_v18 = vld [vmem:[#allocation10 + $0x8] sm:$0xff] }
  0x8e   :  { %v1178_v16 = vpack.c.bf16 %v357_v15, %v356_v13  ;;  %v444_v19 = vld [vmem:[#allocation10 + $0x10] sm:$0xff]  ;;  %v1182_v20 = vpack.c.bf16 %v443_v18, %v442_v17  ;;  %v445_v21 = vld [vmem:[#allocation10 + $0x18] sm:$0xff]  ;;  %v446_v23 = vld [vmem:[#allocation10 + $0x20] sm:$0xff] }
  0x8f   :  { %1133 = vmatpush3.bf16.msra.mxu1 %v1130_v29  ;;  %v1186_v22 = vpack.c.bf16 %v445_v21, %v444_v19  ;;  %v447_v24 = vld [vmem:[#allocation10 + $0x28] sm:$0xff]  ;;  %v449_v27 = vld [vmem:[#allocation10 + $0x38] sm:$0xff]  ;;  %v763_v29 = vld [vmem:[%s1737_s4] ss:$0 sm:$0xff] }
  0x90   :  { %1105 = vmatpush3.bf16.msra.mxu0 %v1102_v26  ;;  %1135 = vmatprep.subr.bf16.mxu1 %v1134_v40  ;;  %v1190_v25 = vpack.c.bf16 %v447_v24, %v446_v23  ;;  %v448_v26 = vld [vmem:[#allocation10 + $0x30] sm:$0xff]  ;;  %v454_v42 = vld [vmem:[#allocation10 + $0x60] sm:$0xff]  ;;  %v457_v46 = vld [vmem:[#allocation10 + $0x78] sm:$0xff] }
  0x91   :  { %1107 = vmatprep.subr.bf16.mxu0 %v1106_v30  ;;  %v1194_v28 = vpack.c.bf16 %v449_v27, %v448_v26  ;;  %v452_v39 = vld [vmem:[#allocation10 + $0x50] sm:$0xff]  ;;  %v542_v48 = vld [vmem:[#allocation11] sm:$0xff]  ;;  %v545_v52 = vld [vmem:[#allocation11 + $0x18] sm:$0xff] }
  0x92   :  { %v456_v44 = vld [vmem:[#allocation10 + $0x70] sm:$0xff]  ;;  %v546_v54 = vld [vmem:[#allocation11 + $0x20] sm:$0xff]  ;;  %v557_v13 = vld [vmem:[#allocation11 + $0x78] sm:$0xff] }
  0x93   :  { %1137 = vmatpush3.bf16.msra.mxu1 %v1134_v40  ;;  %v453_v40 = vld [vmem:[#allocation10 + $0x58] sm:$0xff]  ;;  %v544_v50 = vld [vmem:[#allocation11 + $0x10] sm:$0xff]  ;;  %v554_v9 = vld [vmem:[#allocation11 + $0x60] sm:$0xff] }
  0x94   :  { %1109 = vmatpush3.bf16.msra.mxu0 %v1106_v30  ;;  %1139 = vmatprep.subr.bf16.mxu1 %v1138_v43  ;;  %v1202_v41 = vpack.c.bf16 %v453_v40, %v452_v39  ;;  %v548_v57 = vld [vmem:[#allocation11 + $0x30] sm:$0xff]  ;;  %v642_v15 = vld [vmem:[#allocation13] sm:$0xff]  ;;  %v645_v19 = vld [vmem:[#allocation13 + $0x18] sm:$0xff] }
  0x95   :  { %1111 = vmatprep.subr.bf16.mxu0 %v1110_v33  ;;  %v764_v60 = vld [vmem:[%s1739_s6] ss:$0 sm:$0xff]  ;;  %v646_v21 = vld [vmem:[#allocation13 + $0x20] sm:$0xff] }
  0x96   :  { %v552_v6 = vld [vmem:[#allocation11 + $0x50] sm:$0xff]  ;;  %v654_v40 = vld [vmem:[#allocation13 + $0x60] sm:$0xff] }
  0x97   :  { %1141 = vmatpush3.bf16.msra.mxu1 %v1138_v43  ;;  %v455_v43 = vld [vmem:[#allocation10 + $0x68] sm:$0xff]  ;;  %v556_v11 = vld [vmem:[#allocation11 + $0x70] sm:$0xff] }
  0x98   :  { %1113 = vmatpush3.bf16.msra.mxu0 %v1110_v33  ;;  %1143 = vmatprep.subr.bf16.mxu1 %v1142_v47  ;;  %v1206_v45 = vpack.c.bf16 %v455_v43, %v454_v42  ;;  %v644_v17 = vld [vmem:[#allocation13 + $0x10] sm:$0xff] }
  0x99   :  { %1115 = vmatprep.subr.bf16.mxu0 %v1114_v36  ;;  %v648_v24 = vld [vmem:[#allocation13 + $0x30] sm:$0xff] }
  0x9a   :  { %v765_v27 = vld [vmem:[%s1741_s8] ss:$0 sm:$0xff] }
  0x9b   :  { %1145 = vmatpush3.bf16.msra.mxu1 %v1142_v47  ;;  %v1210_v47 = vpack.c.bf16 %v457_v46, %v456_v44  ;;  %v656_v42 = vld [vmem:[#allocation13 + $0x70] sm:$0xff]  ;;  %v657_v44 = vld [vmem:[#allocation13 + $0x78] sm:$0xff] }
  0x9c   :  { %1117 = vmatpush3.bf16.msra.mxu0 %v1114_v36  ;;  %1147 = vmatprep.subr.bf16.mxu1 %v1146_v49  ;;  %v450_v36 = vld [vmem:[#allocation10 + $0x40] sm:$0xff]  ;;  %v766_v46 = vld [vmem:[%s1743_s10] ss:$0 sm:$0xff]  ;;  %s1462_s10 = scalar_lea.vmem %s748_s29, 256 }
  0x9d   :  { %1151 = vmatprep.subr.bf16.mxu0 %v1150_v53  ;;  %p1463_p0 = scmp.ne.s32.totalorder %s748_s29, %s1462_s10  ;;  %p1468_p2 = scmp.lt.s32.totalorder %s1462_s10, %s1462_s10 }
  0x9f   :  { %909 = vmatmul.mubr.f32.vlgmr.msra.gmra.mrb[0].mxu0 %v141_v37  ;;  %1149 = vmatpush3.bf16.msra.mxu1 %v1146_v49  ;;  %v451_v37 = vld [vmem:[#allocation10 + $0x48] sm:$0xff]  ;;  %p1469_p3 = por %p1468_p2, %p1467_p1 }
  0xa0   :  { %1153 = vmatpush3.bf16.msra.mxu0 %v1150_v53  ;;  %1183 = vmatprep.subr.bf16.mxu1 %v1182_v20  ;;  %v1198_v38 = vpack.c.bf16 %v451_v37, %v450_v36  ;;  %v543_v49 = vld [vmem:[#allocation11 + $0x8] sm:$0xff]  ;;  %v1218_v53 = vpack.c.bf16 %v545_v52, %v544_v50  ;;  %v652_v37 = vld [vmem:[#allocation13 + $0x50] sm:$0xff] }
  0xa1   :  { %1155 = vmatprep.subr.bf16.mxu0 %v1154_v55  ;;  %v1214_v51 = vpack.c.bf16 %v543_v49, %v542_v48  ;;  %p1470_p4 = pnand %p1469_p3, %p1463_p0 }
  0xa4   :  { %1157 = vmatpush3.bf16.msra.mxu0 %v1154_v55  ;;  %v547_v55 = vld [vmem:[#allocation11 + $0x28] sm:$0xff] }
  0xa5   :  { %1159 = vmatprep.subr.bf16.mxu0 %v1158_v58  ;;  %v1222_v56 = vpack.c.bf16 %v547_v55, %v546_v54 }
  0xa8   :  { %1161 = vmatpush3.bf16.msra.mxu0 %v1158_v58  ;;  %v549_v58 = vld [vmem:[#allocation11 + $0x38] sm:$0xff] }
  0xa9   :  { %1163 = vmatprep.subr.bf16.mxu0 %v1162_v61  ;;  %v1226_v59 = vpack.c.bf16 %v549_v58, %v548_v57 }
  0xac   :  { %1165 = vmatpush3.bf16.msra.mxu0 %v1162_v61 }
  0xad   :  { %1167 = vmatprep.subr.bf16.mxu0 %v1166_v7 }
  0xb0   :  { %1169 = vmatpush3.bf16.msra.mxu0 %v1166_v7  ;;  %v553_v7 = vld [vmem:[#allocation11 + $0x58] sm:$0xff] }
  0xb1   :  { %1171 = vmatprep.subr.bf16.mxu0 %v1170_v10  ;;  %v1234_v8 = vpack.c.bf16 %v553_v7, %v552_v6 }
  0xb4   :  { %1173 = vmatpush3.bf16.msra.mxu0 %v1170_v10  ;;  %v555_v10 = vld [vmem:[#allocation11 + $0x68] sm:$0xff] }
  0xb5   :  { %1175 = vmatprep.subr.bf16.mxu0 %v1174_v14  ;;  %v1238_v12 = vpack.c.bf16 %v555_v10, %v554_v9 }
  0xb8   :  { %1177 = vmatpush3.bf16.msra.mxu0 %v1174_v14  ;;  %v1242_v14 = vpack.c.bf16 %v557_v13, %v556_v11 }
  0xb9   :  { %1179 = vmatprep.subr.bf16.mxu0 %v1178_v16 }
  0xbc   :  { %1181 = vmatpush3.bf16.msra.mxu0 %v1178_v16  ;;  %v643_v16 = vld [vmem:[#allocation13 + $0x8] sm:$0xff] }
  0xbd   :  { %1215 = vmatprep.subr.bf16.mxu0 %v1214_v51  ;;  %v1246_v18 = vpack.c.bf16 %v643_v16, %v642_v15 }
 0x172   :  { %v910_v63 = vpop.f32.mrb[0].mxu0 }
 0x173   :  { %v237_v0 = vadd.f32 %v910_v63, %v762_v62  ;;  %v231_v1 = vpop.f32.mrb[1].mxu0 }
 0x174   :  { %v232_v2 = vadd.f32 %v762_v62, %v231_v1 }
 0x176   :  { %1288 = vtanh.f32 %v232_v2 }
 0x177   :  { %1290 = vtanh.f32 %v237_v0 }
 0x180   :  { %v1289_v3 = vpop.eup %1288 }
 0x181   :  { %v1291_v4 = vpop.eup %1290  ;;  %943 = vmatprep.mubr.f32.mxu1 %v1289_v3  ;;  %v550_v3 = vld [vmem:[#allocation11 + $0x40] sm:$0xff] }
 0x182   :  { %944 = vmatmul.mubr.f32.vlgmr.msra.gmra.mrb[0].mxu1 %v1291_v4  ;;  %v551_v4 = vld [vmem:[#allocation11 + $0x48] sm:$0xff] }
 0x183   :  { %1185 = vmatpush3.bf16.msra.mxu1 %v1182_v20  ;;  %v1230_v5 = vpack.c.bf16 %v551_v4, %v550_v3  ;;  %v1250_v20 = vpack.c.bf16 %v645_v19, %v644_v17 }
 0x184   :  { %1187 = vmatprep.subr.bf16.mxu1 %v1186_v22 }
 0x187   :  { %1189 = vmatpush3.bf16.msra.mxu1 %v1186_v22  ;;  %v647_v22 = vld [vmem:[#allocation13 + $0x28] sm:$0xff] }
 0x188   :  { %1191 = vmatprep.subr.bf16.mxu1 %v1190_v25  ;;  %v1254_v23 = vpack.c.bf16 %v647_v22, %v646_v21 }
 0x18b   :  { %1193 = vmatpush3.bf16.msra.mxu1 %v1190_v25  ;;  %v649_v25 = vld [vmem:[#allocation13 + $0x38] sm:$0xff] }
 0x18c   :  { %1195 = vmatprep.subr.bf16.mxu1 %v1194_v28  ;;  %v1258_v26 = vpack.c.bf16 %v649_v25, %v648_v24 }
 0x18f   :  { %1197 = vmatpush3.bf16.msra.mxu1 %v1194_v28 }
 0x190   :  { %1199 = vmatprep.subr.bf16.mxu1 %v1198_v38 }
 0x193   :  { %1201 = vmatpush3.bf16.msra.mxu1 %v1198_v38  ;;  %v653_v38 = vld [vmem:[#allocation13 + $0x58] sm:$0xff] }
 0x194   :  { %1203 = vmatprep.subr.bf16.mxu1 %v1202_v41  ;;  %v1266_v39 = vpack.c.bf16 %v653_v38, %v652_v37 }
 0x197   :  { %1205 = vmatpush3.bf16.msra.mxu1 %v1202_v41  ;;  %v655_v41 = vld [vmem:[#allocation13 + $0x68] sm:$0xff] }
 0x198   :  { %1207 = vmatprep.subr.bf16.mxu1 %v1206_v45  ;;  %v1270_v43 = vpack.c.bf16 %v655_v41, %v654_v40 }
 0x19b   :  { %1209 = vmatpush3.bf16.msra.mxu1 %v1206_v45  ;;  %v1274_v45 = vpack.c.bf16 %v657_v44, %v656_v42 }
 0x19c   :  { %1211 = vmatprep.subr.bf16.mxu1 %v1210_v47 }
 0x19f   :  { %1213 = vmatpush3.bf16.msra.mxu1 %v1210_v47 }
 0x1a0   :  { %1247 = vmatprep.subr.bf16.mxu1 %v1246_v18 }
 0x255   :  { %v945_v30 = vpop.f32.mrb[0].mxu1 }
 0x256   :  { %v337_v31 = vadd.f32 %v945_v30, %v763_v29  ;;  %v331_v32 = vpop.f32.mrb[1].mxu1 }
 0x257   :  { %v332_v33 = vadd.f32 %v763_v29, %v331_v32 }
 0x259   :  { %1292 = vtanh.f32 %v332_v33 }
 0x25a   :  { %1294 = vtanh.f32 %v337_v31 }
 0x263   :  { %v1293_v34 = vpop.eup %1292 }
 0x264   :  { %v1295_v35 = vpop.eup %1294  ;;  %978 = vmatprep.mubr.f32.mxu0 %v1293_v34  ;;  %v650_v34 = vld [vmem:[#allocation13 + $0x40] sm:$0xff] }
 0x265   :  { %979 = vmatmul.mubr.f32.vlgmr.msra.gmra.mrb[2].mxu0 %v1295_v35  ;;  %v651_v35 = vld [vmem:[#allocation13 + $0x48] sm:$0xff] }
 0x266   :  { %1217 = vmatpush3.bf16.msra.mxu0 %v1214_v51  ;;  %v1262_v36 = vpack.c.bf16 %v651_v35, %v650_v34 }
 0x267   :  { %1219 = vmatprep.subr.bf16.mxu0 %v1218_v53 }
 0x26a   :  { %1221 = vmatpush3.bf16.msra.mxu0 %v1218_v53  ;;  %v767_v53 = vld [vmem:[%s1745_s12] ss:$0 sm:$0xff] }
 0x26b   :  { %1223 = vmatprep.subr.bf16.mxu0 %v1222_v56 }
 0x26e   :  { %1225 = vmatpush3.bf16.msra.mxu0 %v1222_v56 }
 0x26f   :  { %1227 = vmatprep.subr.bf16.mxu0 %v1226_v59 }
 0x272   :  { %1229 = vmatpush3.bf16.msra.mxu0 %v1226_v59 }
 0x273   :  { %1231 = vmatprep.subr.bf16.mxu0 %v1230_v5 }
 0x276   :  { %1233 = vmatpush3.bf16.msra.mxu0 %v1230_v5 }
 0x277   :  { %1235 = vmatprep.subr.bf16.mxu0 %v1234_v8 }
 0x27a   :  { %1237 = vmatpush3.bf16.msra.mxu0 %v1234_v8 }
 0x27b   :  { %1239 = vmatprep.subr.bf16.mxu0 %v1238_v12 }
 0x27e   :  { %1241 = vmatpush3.bf16.msra.mxu0 %v1238_v12 }
 0x27f   :  { %1243 = vmatprep.subr.bf16.mxu0 %v1242_v14 }
 0x282   :  { %1245 = vmatpush3.bf16.msra.mxu0 %v1242_v14 }
 0x338   :  { %v980_v61 = vpop.f32.mrb[2].mxu0 }
 0x339   :  { %v437_v62 = vadd.f32 %v980_v61, %v764_v60  ;;  %v431_v63 = vpop.f32.mrb[3].mxu0 }
 0x33a   :  { %v432_v0 = vadd.f32 %v764_v60, %v431_v63 }
 0x33c   :  { %1296 = vtanh.f32 %v432_v0 }
 0x33d   :  { %1298 = vtanh.f32 %v437_v62 }
 0x346   :  { %v1297_v1 = vpop.eup %1296 }
 0x347   :  { %v1299_v2 = vpop.eup %1298  ;;  %1013 = vmatprep.mubr.f32.mxu1 %v1297_v1 }
 0x348   :  { %1014 = vmatmul.mubr.f32.vlgmr.msra.gmra.mrb[2].mxu1 %v1299_v2 }
 0x349   :  { %1249 = vmatpush3.bf16.msra.mxu1 %v1246_v18 }
 0x34a   :  { %1251 = vmatprep.subr.bf16.mxu1 %v1250_v20 }
 0x34d   :  { %1253 = vmatpush3.bf16.msra.mxu1 %v1250_v20 }
 0x34e   :  { %1255 = vmatprep.subr.bf16.mxu1 %v1254_v23 }
 0x351   :  { %1257 = vmatpush3.bf16.msra.mxu1 %v1254_v23 }
 0x352   :  { %1259 = vmatprep.subr.bf16.mxu1 %v1258_v26 }
 0x355   :  { %1261 = vmatpush3.bf16.msra.mxu1 %v1258_v26 }
 0x356   :  { %1263 = vmatprep.subr.bf16.mxu1 %v1262_v36 }
 0x359   :  { %1265 = vmatpush3.bf16.msra.mxu1 %v1262_v36 }
 0x35a   :  { %1267 = vmatprep.subr.bf16.mxu1 %v1266_v39 }
 0x35d   :  { %1269 = vmatpush3.bf16.msra.mxu1 %v1266_v39 }
 0x35e   :  { %1271 = vmatprep.subr.bf16.mxu1 %v1270_v43 }
 0x361   :  { %1273 = vmatpush3.bf16.msra.mxu1 %v1270_v43 }
 0x362   :  { %1275 = vmatprep.subr.bf16.mxu1 %v1274_v45 }
 0x365   :  { %1277 = vmatpush3.bf16.msra.mxu1 %v1274_v45 }
 0x41b   :  { %v1015_v28 = vpop.f32.mrb[2].mxu1 }
 0x41c   :  { %v537_v29 = vadd.f32 %v1015_v28, %v765_v27  ;;  %v531_v30 = vpop.f32.mrb[3].mxu1 }
 0x41d   :  { %v532_v31 = vadd.f32 %v765_v27, %v531_v30 }
 0x41f   :  { %1300 = vtanh.f32 %v532_v31 }
 0x420   :  { %1302 = vtanh.f32 %v537_v29 }
 0x429   :  { %v1301_v32 = vpop.eup %1300 }
 0x42a   :  { %v1303_v33 = vpop.eup %1302  ;;  %1048 = vmatprep.mubr.f32.mxu0 %v1301_v32 }
 0x42b   :  { %1049 = vmatmul.mubr.f32.vlgmr.msra.gmra.mrb[4].mxu0 %v1303_v33 }
 0x4fe   :  { %v1050_v47 = vpop.f32.mrb[4].mxu0 }
 0x4ff   :  { %v637_v48 = vadd.f32 %v1050_v47, %v766_v46  ;;  %v631_v49 = vpop.f32.mrb[5].mxu0 }
 0x500   :  { %v632_v50 = vadd.f32 %v766_v46, %v631_v49 }
 0x502   :  { %1304 = vtanh.f32 %v632_v50 }
 0x503   :  { %1306 = vtanh.f32 %v637_v48 }
 0x50c   :  { %v1305_v51 = vpop.eup %1304 }
 0x50d   :  { %v1307_v52 = vpop.eup %1306  ;;  %1083 = vmatprep.mubr.f32.mxu1 %v1305_v51 }
 0x50e   :  { %1084 = vmatmul.mubr.f32.vlgmr.msra.gmra.mrb[4].mxu1 %v1307_v52 }
 0x5e1   :  { %v1085_v54 = vpop.f32.mrb[4].mxu1 }
 0x5e2   :  { %v737_v55 = vadd.f32 %v1085_v54, %v767_v53  ;;  %v731_v56 = vpop.f32.mrb[5].mxu1 }
 0x5e3   :  { %v732_v57 = vadd.f32 %v767_v53, %v731_v56 }
 0x5e4   :  { %741 = vst [vmem:[#allocation14 + $0x8] sm:$0xff] %v737_v55 }
 0x5e5   :  { %740 = vst [vmem:[#allocation14] sm:$0xff] %v732_v57 }
 0x5e6   :  { %1473 = shalt.err (!%p1470_p4)
}
 0x5e7   :  { %s1474_s12 = scalar_lea.hbm %s1746_s13, 256 }
 0x5e8   :  { %p1475_p5 = scmp.ne.s32.totalorder %s1746_s13, %s1474_s12  ;;  %p1478_p6 = scmp.lt.u32.totalorder %s1474_s12, %s1746_s13 }
 0x5ea   :  { %p1480_p7 = pnand %p1478_p6, %p1475_p5 }
 0x5ec   :  { %1483 = shalt.err (!%p1480_p7)
}
 0x5ed   :  { %753 = dma.vmem_to_hbm [thread:$0]  %s748_s29, 256, %s1746_s13, [#allocation4], %s1496_s20, %s1496_s20, %s1497_s21  }
 0x5ee   :  { %1492 = dma.done.wait [#allocation4], 256  }
 0x5ef   :  { %1493 = vsyncadd [#allocation4], 4294967040 }
 0x5f0   :  { %757 = vsyncpa [#allocation3], 1 }
 0x5f1   :  { %758 = vsyncpa [#allocation6], 1 }
 0x5f2   :  { %759 = vsyncpa [#allocation9], 1 }
 0x5f3   :  { %760 = vsyncpa [#allocation12], 1 }
 0x5f4   :  { %761 = vsyncpa [#allocation4], 1 }

</bundles_post_ra>
